<compile_context>
chip_gen: v6e
topology: v6e:2x2x1
jax: 0.10.0
libtpu: 0.0.40
codegen_flags: <defaults>
</compile_context>

<pallas_src>
import math

import jax
import jax.numpy as jnp
from jax import lax
from jax.experimental import pallas as pl
from jax.experimental.pallas import tpu as pltpu


H = 500           # hidden width from the module
HP = 512          # hidden padded to a lane multiple
TILE_OUT = 256    # fc3 output tile (lane multiple)
BN_EPS = 1e-6     # nn.BatchNorm1d(500, eps=1e-06) in the module


def _softplus(v):
    # matches F.softplus(beta=1, threshold=20)
    return jnp.where(v > 20.0, v, jnp.log1p(jnp.exp(jnp.minimum(v, 20.0))))


def generator_kernel(x_ref, w1_ref, w2_ref, b1_ref, b2_ref,
                     w3_ref, s3_ref, b3_ref, o_ref, h2_ref):
    # ---- fc1 + BN1 + bn1_b + softplus, fc2 + BN2 + bn2_b + softplus ----
    # Computed once (first OUT tile); result carried in VMEM scratch h2_ref.
    @pl.when(pl.program_id(0) == 0)
    def _():
        x = x_ref[...]                                              # (B, Z)
        h1 = jnp.dot(x, w1_ref[...].astype(jnp.float32),
                     preferred_element_type=jnp.float32)            # (B, HP)
        m1 = jnp.mean(h1, axis=0, keepdims=True)
        v1 = jnp.mean((h1 - m1) ** 2, axis=0, keepdims=True)        # biased var
        h1 = _softplus((h1 - m1) * lax.rsqrt(v1 + BN_EPS) + b1_ref[...])

        h2 = jnp.dot(h1, w2_ref[...].astype(jnp.float32),
                     preferred_element_type=jnp.float32)            # (B, HP)
        m2 = jnp.mean(h2, axis=0, keepdims=True)
        v2 = jnp.mean((h2 - m2) ** 2, axis=0, keepdims=True)
        h2_ref[...] = _softplus((h2 - m2) * lax.rsqrt(v2 + BN_EPS) + b2_ref[...])

    # ---- fc3 tile: weight-norm folded into host-computed per-column scale ----
    h3 = jnp.dot(h2_ref[...], w3_ref[...].astype(jnp.float32),
                 preferred_element_type=jnp.float32)                 # (B, TILE_OUT)
    o_ref[...] = _softplus(h3 * s3_ref[...] + b3_ref[...])


def _pad2d(a, rows, cols, fill=0.0):
    return jnp.pad(a, ((0, rows - a.shape[0]), (0, cols - a.shape[1])),
                   constant_values=fill)


def generator_forward(x, w1, w2, w3, b1, b2, b3):
    """x: (B, z_dim) f32. Weights pre-transposed to (in, out), f32.
    b1/b2: (1, 500) bn biases; b3: (1, OUT) fc3 bias."""
    B, Z = x.shape
    OUT = w3.shape[1]
    out_p = pl.cdiv(OUT, TILE_OUT) * TILE_OUT
    n_tiles = out_p // TILE_OUT

    # fc3 weight-norm scale (LinearWeightNorm, weight_scale=1), computed on the
    # host over the UNPADDED columns (avoids rsqrt(0) on padded columns).
    inv_norm = lax.rsqrt(jnp.sum(w3 * w3, axis=0, keepdims=True))    # (1, OUT)

    # Zero-pad to (8,128)-friendly shapes; store weights as bf16 (halves DMA).
    w1_p = _pad2d(w1, Z, HP).astype(jnp.bfloat16)
    w2_p = _pad2d(w2, HP, HP).astype(jnp.bfloat16)
    w3_p = _pad2d(w3, HP, out_p).astype(jnp.bfloat16)
    s3_p = _pad2d(inv_norm, 1, out_p, fill=1.0)
    b1_p = _pad2d(b1, 1, HP)
    b2_p = _pad2d(b2, 1, HP)
    b3_p = _pad2d(b3, 1, out_p)

    const = lambda j: (0, 0)
    tiled = lambda j: (0, j)

    out = pl.pallas_call(
        generator_kernel,
        out_shape=jax.ShapeDtypeStruct((B, out_p), jnp.float32),
        grid=(n_tiles,),
        in_specs=[
            pl.BlockSpec((B, Z), const),            # x
            pl.BlockSpec((Z, HP), const),           # w1 (bf16)
            pl.BlockSpec((HP, HP), const),          # w2 (bf16)
            pl.BlockSpec((1, HP), const),           # bn1_b
            pl.BlockSpec((1, HP), const),           # bn2_b
            pl.BlockSpec((HP, TILE_OUT), tiled),    # w3 tile (bf16)
            pl.BlockSpec((1, TILE_OUT), tiled),     # inv_norm tile
            pl.BlockSpec((1, TILE_OUT), tiled),     # b3 tile
        ],
        out_specs=pl.BlockSpec((B, TILE_OUT), tiled),
        scratch_shapes=[pltpu.VMEM((B, HP), jnp.float32)],   # carried h2
        compiler_params=pltpu.CompilerParams(
            # h2 scratch is carried across the OUT-tile axis -> must be serial.
            dimension_semantics=("arbitrary",),
        ),
    )(x, w1_p, w2_p, b1_p, b2_p, w3_p, s3_p, b3_p)

    return out[:, :OUT]


def generator_reference(x, w1, w2, w3, b1, b2, b3):
    """Pure-JAX reference mirroring the kernel path (same bf16 weight rounding)."""
    def rq(w):
        return w.astype(jnp.bfloat16).astype(jnp.float32)

    def sp(v):
        return jnp.where(v > 20.0, v, jnp.log1p(jnp.exp(jnp.minimum(v, 20.0))))

    def bn(h):
        m = jnp.mean(h, axis=0, keepdims=True)
        v = jnp.mean((h - m) ** 2, axis=0, keepdims=True)
        return (h - m) / jnp.sqrt(v + BN_EPS)

    inv_norm = 1.0 / jnp.sqrt(jnp.sum(w3 * w3, axis=0, keepdims=True))
    h1 = sp(bn(x @ rq(w1)) + b1)
    h2 = sp(bn(h1 @ rq(w2)) + b2)
    return sp((h2 @ rq(w3)) * inv_norm + b3)


if __name__ == "__main__":
    B = 8            # batch_size argument of Generator.forward
    Z_DIM = 32       # z_dim
    OUT = 28 ** 2    # output_dim default = 784

    key = jax.random.PRNGKey(0)
    k1, k2, k3, kx = jax.random.split(key, 4)

    # fc1 / fc2: xavier_uniform, stored transposed as (in, out)
    bound1 = math.sqrt(6.0 / (Z_DIM + H))
    w1 = jax.random.uniform(k1, (Z_DIM, H), minval=-bound1, maxval=bound1,
                            dtype=jnp.float32)
    bound2 = math.sqrt(6.0 / (H + H))
    w2 = jax.random.uniform(k2, (H, H), minval=-bound2, maxval=bound2,
                            dtype=jnp.float32)
    # fc3 = LinearWeightNorm: weight ~ N(0, 0.1^2), bias zeros (transposed (in, out))
    w3 = (0.1 * jax.random.normal(k3, (H, OUT))).astype(jnp.float32)
    b3 = jnp.zeros((1, OUT), jnp.float32)
    # bn1_b / bn2_b parameters (zeros at init)
    b1 = jnp.zeros((1, H), jnp.float32)
    b2 = jnp.zeros((1, H), jnp.float32)

    # z ~ U[0,1) drawn inside forward() in the PyTorch module
    x = jax.random.uniform(kx, (B, Z_DIM), dtype=jnp.float32)

    out = generator_forward(x, w1, w2, w3, b1, b2, b3)
    out = jax.block_until_ready(out)

    ref = generator_reference(x, w1, w2, w3, b1, b2, b3)
    assert out.shape == (B, OUT)
    assert jnp.allclose(out, ref, atol=1e-3, rtol=1e-3), (
        float(jnp.max(jnp.abs(out - ref))))

    print("KERNEL_OK")
</pallas_src>

<mosaic_0001>
module attributes {stable_mosaic.version = 11 : i64} {
  func.func @generator_kernel(%arg0: i32, %arg1: memref<8x32xf32, #tpu.memory_space<vmem>>, %arg2: memref<32x512xbf16, #tpu.memory_space<vmem>>, %arg3: memref<512x512xbf16, #tpu.memory_space<vmem>>, %arg4: memref<1x512xf32, #tpu.memory_space<vmem>>, %arg5: memref<1x512xf32, #tpu.memory_space<vmem>>, %arg6: memref<512x256xbf16, #tpu.memory_space<vmem>>, %arg7: memref<1x256xf32, #tpu.memory_space<vmem>>, %arg8: memref<1x256xf32, #tpu.memory_space<vmem>>, %arg9: memref<8x256xf32, #tpu.memory_space<vmem>>, %arg10: memref<8x512xf32, #tpu.memory_space<vmem>>) attributes {dimension_semantics = [#tpu.dimension_semantics<arbitrary>], iteration_bounds = array<i64: 4>, scalar_prefetch = 0 : i64, scratch_operands = 1 : i64, tpu.core_type = #tpu.core_type<tc>, window_params = [{pipeline_mode = #tpu.pipeline_mode<synchronous>, transform_indices = @transform_0, window_bounds = array<i64: 8, 32>}, {pipeline_mode = #tpu.pipeline_mode<synchronous>, transform_indices = @transform_1, window_bounds = array<i64: 32, 512>}, {pipeline_mode = #tpu.pipeline_mode<synchronous>, transform_indices = @transform_2, window_bounds = array<i64: 512, 512>}, {pipeline_mode = #tpu.pipeline_mode<synchronous>, transform_indices = @transform_3, window_bounds = array<i64: 1, 512>}, {pipeline_mode = #tpu.pipeline_mode<synchronous>, transform_indices = @transform_4, window_bounds = array<i64: 1, 512>}, {transform_indices = @transform_5, window_bounds = array<i64: 512, 256>}, {transform_indices = @transform_6, window_bounds = array<i64: 1, 256>}, {transform_indices = @transform_7, window_bounds = array<i64: 1, 256>}, {transform_indices = @transform_8, window_bounds = array<i64: 8, 256>}]} {
    %c0_i32 = arith.constant 0 : i32
    %0 = arith.cmpi eq, %arg0, %c0_i32 : i32
    %1 = arith.extui %0 : i1 to i32
    %c0_i32_0 = arith.constant 0 : i32
    %2 = arith.cmpi ne, %1, %c0_i32_0 : i32
    scf.if %2 {
      %c0_12 = arith.constant 0 : index
      %c0_13 = arith.constant 0 : index
      %21 = vector.load %arg1[%c0_12, %c0_13] : memref<8x32xf32, #tpu.memory_space<vmem>>, vector<8x32xf32>
      %c0_14 = arith.constant 0 : index
      %c0_15 = arith.constant 0 : index
      %22 = vector.load %arg2[%c0_14, %c0_15] : memref<32x512xbf16, #tpu.memory_space<vmem>>, vector<32x512xbf16>
      %23 = arith.extf %22 : vector<32x512xbf16> to vector<32x512xf32>
      %cst_16 = arith.constant dense<0.000000e+00> : vector<8x512xf32>
      %24 = tpu.matmul %21, %23, %cst_16 {dimension_numbers = #tpu.dot_dimension_numbers<[1], [0], [0], [1], [0, 0, 1, 1], [], []>} : vector<8x32xf32>, vector<32x512xf32>, vector<8x512xf32> -> vector<8x512xf32>
      %cst_17 = arith.constant dense<0.000000e+00> : vector<512xf32>
      %25 = vector.multi_reduction <add>, %24, %cst_17 [0] : vector<8x512xf32> to vector<512xf32>
      %26 = vector.shape_cast %25 : vector<512xf32> to vector<1x512xf32>
      %cst_18 = arith.constant 8.000000e+00 : f32
      %27 = vector.broadcast %cst_18 : f32 to vector<1x512xf32>
      %28 = arith.divf %26, %27 : vector<1x512xf32>
      %29 = vector.broadcast %28 : vector<1x512xf32> to vector<8x512xf32>
      %30 = arith.subf %24, %29 : vector<8x512xf32>
      %31 = arith.mulf %30, %30 : vector<8x512xf32>
      %cst_19 = arith.constant dense<0.000000e+00> : vector<512xf32>
      %32 = vector.multi_reduction <add>, %31, %cst_19 [0] : vector<8x512xf32> to vector<512xf32>
      %33 = vector.shape_cast %32 : vector<512xf32> to vector<1x512xf32>
      %cst_20 = arith.constant 8.000000e+00 : f32
      %34 = vector.broadcast %cst_20 : f32 to vector<1x512xf32>
      %35 = arith.divf %33, %34 : vector<1x512xf32>
      %36 = vector.broadcast %28 : vector<1x512xf32> to vector<8x512xf32>
      %37 = arith.subf %24, %36 : vector<8x512xf32>
      %cst_21 = arith.constant 9.99999997E-7 : f32
      %38 = vector.broadcast %cst_21 : f32 to vector<1x512xf32>
      %39 = arith.addf %35, %38 : vector<1x512xf32>
      %40 = math.rsqrt %39 : vector<1x512xf32>
      %41 = vector.broadcast %40 : vector<1x512xf32> to vector<8x512xf32>
      %42 = arith.mulf %37, %41 : vector<8x512xf32>
      %c0_22 = arith.constant 0 : index
      %c0_23 = arith.constant 0 : index
      %43 = vector.load %arg4[%c0_22, %c0_23] : memref<1x512xf32, #tpu.memory_space<vmem>>, vector<1x512xf32>
      %44 = vector.broadcast %43 : vector<1x512xf32> to vector<8x512xf32>
      %45 = arith.addf %42, %44 : vector<8x512xf32>
      %cst_24 = arith.constant 2.000000e+01 : f32
      %46 = vector.broadcast %cst_24 : f32 to vector<8x512xf32>
      %47 = arith.cmpf ogt, %45, %46 : vector<8x512xf32>
      %cst_25 = arith.constant 2.000000e+01 : f32
      %48 = vector.broadcast %cst_25 : f32 to vector<8x512xf32>
      %49 = arith.minimumf %45, %48 : vector<8x512xf32>
      %50 = math.exp %49 : vector<8x512xf32>
      %51 = math.log1p %50 : vector<8x512xf32>
      %52 = arith.select %47, %45, %51 : vector<8x512xi1>, vector<8x512xf32>
      %c0_26 = arith.constant 0 : index
      %c0_27 = arith.constant 0 : index
      %53 = vector.load %arg3[%c0_26, %c0_27] : memref<512x512xbf16, #tpu.memory_space<vmem>>, vector<512x512xbf16>
      %54 = arith.extf %53 : vector<512x512xbf16> to vector<512x512xf32>
      %cst_28 = arith.constant dense<0.000000e+00> : vector<8x512xf32>
      %55 = tpu.matmul %52, %54, %cst_28 {dimension_numbers = #tpu.dot_dimension_numbers<[1], [0], [0], [1], [0, 0, 1, 1], [], []>} : vector<8x512xf32>, vector<512x512xf32>, vector<8x512xf32> -> vector<8x512xf32>
      %cst_29 = arith.constant dense<0.000000e+00> : vector<512xf32>
      %56 = vector.multi_reduction <add>, %55, %cst_29 [0] : vector<8x512xf32> to vector<512xf32>
      %57 = vector.shape_cast %56 : vector<512xf32> to vector<1x512xf32>
      %cst_30 = arith.constant 8.000000e+00 : f32
      %58 = vector.broadcast %cst_30 : f32 to vector<1x512xf32>
      %59 = arith.divf %57, %58 : vector<1x512xf32>
      %60 = vector.broadcast %59 : vector<1x512xf32> to vector<8x512xf32>
      %61 = arith.subf %55, %60 : vector<8x512xf32>
      %62 = arith.mulf %61, %61 : vector<8x512xf32>
      %cst_31 = arith.constant dense<0.000000e+00> : vector<512xf32>
      %63 = vector.multi_reduction <add>, %62, %cst_31 [0] : vector<8x512xf32> to vector<512xf32>
      %64 = vector.shape_cast %63 : vector<512xf32> to vector<1x512xf32>
      %cst_32 = arith.constant 8.000000e+00 : f32
      %65 = vector.broadcast %cst_32 : f32 to vector<1x512xf32>
      %66 = arith.divf %64, %65 : vector<1x512xf32>
      %67 = vector.broadcast %59 : vector<1x512xf32> to vector<8x512xf32>
      %68 = arith.subf %55, %67 : vector<8x512xf32>
      %cst_33 = arith.constant 9.99999997E-7 : f32
      %69 = vector.broadcast %cst_33 : f32 to vector<1x512xf32>
      %70 = arith.addf %66, %69 : vector<1x512xf32>
      %71 = math.rsqrt %70 : vector<1x512xf32>
      %72 = vector.broadcast %71 : vector<1x512xf32> to vector<8x512xf32>
      %73 = arith.mulf %68, %72 : vector<8x512xf32>
      %c0_34 = arith.constant 0 : index
      %c0_35 = arith.constant 0 : index
      %74 = vector.load %arg5[%c0_34, %c0_35] : memref<1x512xf32, #tpu.memory_space<vmem>>, vector<1x512xf32>
      %75 = vector.broadcast %74 : vector<1x512xf32> to vector<8x512xf32>
      %76 = arith.addf %73, %75 : vector<8x512xf32>
      %cst_36 = arith.constant 2.000000e+01 : f32
      %77 = vector.broadcast %cst_36 : f32 to vector<8x512xf32>
      %78 = arith.cmpf ogt, %76, %77 : vector<8x512xf32>
      %cst_37 = arith.constant 2.000000e+01 : f32
      %79 = vector.broadcast %cst_37 : f32 to vector<8x512xf32>
      %80 = arith.minimumf %76, %79 : vector<8x512xf32>
      %81 = math.exp %80 : vector<8x512xf32>
      %82 = math.log1p %81 : vector<8x512xf32>
      %83 = arith.select %78, %76, %82 : vector<8x512xi1>, vector<8x512xf32>
      %c0_38 = arith.constant 0 : index
      %c0_39 = arith.constant 0 : index
      %84 = vector.load %arg10[%c0_38, %c0_39] : memref<8x512xf32, #tpu.memory_space<vmem>>, vector<8x512xf32>
      tpu.vector_store %arg10[%c0_38, %c0_39], %83 {strides = array<i32>} : memref<8x512xf32, #tpu.memory_space<vmem>>, vector<8x512xf32>,
    } else {
    }
    %c0 = arith.constant 0 : index
    %c0_1 = arith.constant 0 : index
    %3 = vector.load %arg10[%c0, %c0_1] : memref<8x512xf32, #tpu.memory_space<vmem>>, vector<8x512xf32>
    %c0_2 = arith.constant 0 : index
    %c0_3 = arith.constant 0 : index
    %4 = vector.load %arg6[%c0_2, %c0_3] : memref<512x256xbf16, #tpu.memory_space<vmem>>, vector<512x256xbf16>
    %5 = arith.extf %4 : vector<512x256xbf16> to vector<512x256xf32>
    %cst = arith.constant dense<0.000000e+00> : vector<8x256xf32>
    %6 = tpu.matmul %3, %5, %cst {dimension_numbers = #tpu.dot_dimension_numbers<[1], [0], [0], [1], [0, 0, 1, 1], [], []>} : vector<8x512xf32>, vector<512x256xf32>, vector<8x256xf32> -> vector<8x256xf32>
    %c0_4 = arith.constant 0 : index
    %c0_5 = arith.constant 0 : index
    %7 = vector.load %arg7[%c0_4, %c0_5] : memref<1x256xf32, #tpu.memory_space<vmem>>, vector<1x256xf32>
    %8 = vector.broadcast %7 : vector<1x256xf32> to vector<8x256xf32>
    %9 = arith.mulf %6, %8 : vector<8x256xf32>
    %c0_6 = arith.constant 0 : index
    %c0_7 = arith.constant 0 : index
    %10 = vector.load %arg8[%c0_6, %c0_7] : memref<1x256xf32, #tpu.memory_space<vmem>>, vector<1x256xf32>
    %11 = vector.broadcast %10 : vector<1x256xf32> to vector<8x256xf32>
    %12 = arith.addf %9, %11 : vector<8x256xf32>
    %cst_8 = arith.constant 2.000000e+01 : f32
    %13 = vector.broadcast %cst_8 : f32 to vector<8x256xf32>
    %14 = arith.cmpf ogt, %12, %13 : vector<8x256xf32>
    %cst_9 = arith.constant 2.000000e+01 : f32
    %15 = vector.broadcast %cst_9 : f32 to vector<8x256xf32>
    %16 = arith.minimumf %12, %15 : vector<8x256xf32>
    %17 = math.exp %16 : vector<8x256xf32>
    %18 = math.log1p %17 : vector<8x256xf32>
    %19 = arith.select %14, %12, %18 : vector<8x256xi1>, vector<8x256xf32>
    %c0_10 = arith.constant 0 : index
    %c0_11 = arith.constant 0 : index
    %20 = vector.load %arg9[%c0_10, %c0_11] : memref<8x256xf32, #tpu.memory_space<vmem>>, vector<8x256xf32>
    tpu.vector_store %arg9[%c0_10, %c0_11], %19 {strides = array<i32>} : memref<8x256xf32, #tpu.memory_space<vmem>>, vector<8x256xf32>,
    return
  }
  func.func @transform_0(%arg0: i32) -> (i32, i32) {
    %c0_i32 = arith.constant 0 : i32
    %c0_i32_0 = arith.constant 0 : i32
    %c0_i32_1 = arith.constant 0 : i32
    return %c0_i32, %c0_i32_0 : i32, i32
  }
  func.func @transform_1(%arg0: i32) -> (i32, i32) {
    %c0_i32 = arith.constant 0 : i32
    %c0_i32_0 = arith.constant 0 : i32
    %c0_i32_1 = arith.constant 0 : i32
    return %c0_i32, %c0_i32_0 : i32, i32
  }
  func.func @transform_2(%arg0: i32) -> (i32, i32) {
    %c0_i32 = arith.constant 0 : i32
    %c0_i32_0 = arith.constant 0 : i32
    %c0_i32_1 = arith.constant 0 : i32
    return %c0_i32, %c0_i32_0 : i32, i32
  }
  func.func @transform_3(%arg0: i32) -> (i32, i32) {
    %c0_i32 = arith.constant 0 : i32
    %c0_i32_0 = arith.constant 0 : i32
    %c0_i32_1 = arith.constant 0 : i32
    return %c0_i32, %c0_i32_0 : i32, i32
  }
  func.func @transform_4(%arg0: i32) -> (i32, i32) {
    %c0_i32 = arith.constant 0 : i32
    %c0_i32_0 = arith.constant 0 : i32
    %c0_i32_1 = arith.constant 0 : i32
    return %c0_i32, %c0_i32_0 : i32, i32
  }
  func.func @transform_5(%arg0: i32) -> (i32, i32) {
    %c0_i32 = arith.constant 0 : i32
    %c0_i32_0 = arith.constant 0 : i32
    return %c0_i32, %arg0 : i32, i32
  }
  func.func @transform_6(%arg0: i32) -> (i32, i32) {
    %c0_i32 = arith.constant 0 : i32
    %c0_i32_0 = arith.constant 0 : i32
    return %c0_i32, %arg0 : i32, i32
  }
  func.func @transform_7(%arg0: i32) -> (i32, i32) {
    %c0_i32 = arith.constant 0 : i32
    %c0_i32_0 = arith.constant 0 : i32
    return %c0_i32, %arg0 : i32, i32
  }
  func.func @transform_8(%arg0: i32) -> (i32, i32) {
    %c0_i32 = arith.constant 0 : i32
    %c0_i32_0 = arith.constant 0 : i32
    return %c0_i32, %arg0 : i32, i32
  }
}

</mosaic_0001>

<bundles_post_ra>
// kernel: tpu_custom_call.1
= control target key start
LH: loop header
LB: loop body
LE: loop exit
PB: predicated region body
PF: predicated region fallthrough
CT: control target
= control target key end

     0   :  { %s3115_s0 = inlined_call_operand.hbm [shape: f32[8,32], index: 0, kind: input, shape index: {}]   ;;  %s3116_s1 = inlined_call_operand.hbm [shape: bf16[32,512], index: 1, kind: input, shape index: {}]   ;;  %s3117_s2 = inlined_call_operand.hbm [shape: bf16[512,512], index: 2, kind: input, shape index: {}]   ;;  %s3118_s3 = inlined_call_operand.hbm [shape: f32[1,512], index: 3, kind: input, shape index: {}]   ;;  %s3119_s4 = inlined_call_operand.hbm [shape: f32[1,512], index: 4, kind: input, shape index: {}]   ;;  %s3120_s5 = inlined_call_operand.hbm [shape: bf16[512,1024], index: 5, kind: input, shape index: {}]   ;;  %s3121_s6 = inlined_call_operand.vmem [shape: f32[1,1024], index: 6, kind: input, shape index: {}]   ;;  %s3122_s7 = inlined_call_operand.hbm [shape: f32[1,1024], index: 7, kind: input, shape index: {}]   ;;  %s3123_s8 = inlined_call_operand.hbm [shape: f32[8,1024], index: 8, kind: output, shape index: {}]  }
   0x1   :  { %3138 = sst [smem:[#allocation23_spill]] %s3116_s1 }
   0x2   :  { %3139 = sst [smem:[#allocation24_spill]] %s3118_s3 }
   0x3   :  { %3140 = sst [smem:[#allocation25_spill]] %s3120_s5 }
   0x4   :  { %13 = vsyncpa [#allocation4], 0 }
   0x5   :  { %14 = vsyncpa [#allocation7], 0 }
   0x6   :  { %15 = vsyncpa [#allocation10], 0 }
   0x7   :  { %16 = vsyncpa [#allocation13], 0 }
   0x8   :  { %18 = vsyncpa [#allocation13 + $0x1], 0 }
   0x9   :  { %19 = vsyncpa [#allocation5], 0 }
   0xa   :  { %21 = vsyncpa [#allocation5 + $0x1], 0  ;;  %s2694_s27 = smov 0   ;;  %s2696_s28 = smov 0  }
   0xb   :  { %s2698_s29 = smov 0   ;;  %s2700_s30 = smov 0  }
   0xc LB: > { %s2715_s9 = sadd.s32 4294967295, %s2633_s30   ;;  %s2172_s10 = sadd.s32 4294967294, %s2633_s30   ;;  %s2633_s30 = sphi %s2700_s30, %s3173_s30   ;;  %s2629_s29 = sphi %s2698_s29, %s3177_s29   ;;  %s2625_s28 = sphi %s2696_s28, %s3176_s28   ;;  %s2621_s27 = sphi %s2694_s27, %s3175_s27  }
   0xd   : > { %p152_p0 = scmp.ne.s32.totalorder %s2625_s28, %s2621_s27  ;;  %p3124_p1 = scmp.eq.s32.totalorder %s2715_s9, 0 }
   0xe   : > { %p228_p2 = scmp.eq.s32.totalorder %s2715_s9, 3  ;;  %p234_p3 = scmp.eq.s32.totalorder %s2172_s10, 3 }
   0xf   : > { %p2724_p4 = por %p3124_p1, %p152_p0  ;;  %p2173_p5 = scmp.ge.s32.totalorder %s2633_s30, 1 }
  0x10   : > { %p2729_p6 = por %p234_p3, %p152_p0  ;;  %p241_p7 = scmp.lt.s32.totalorder %s2633_s30, 5 }
  0x11   : > { %s3141_s11 = scalar_select %p2724_p4, 1, 0 }
  0x12   : > { %s3142_s12 = scalar_select %p2729_p6, 1, 0 }
  0x13   : > { %p2735_p9 = pnand %p2173_p5, %p241_p7  ;;  %s2635_s14 = smov [#allocation6]  }
  0x14   : > { %s264_s15 = sshll.u32 %s2635_s14, 4  ;;  %s2636_s17 = smov [#allocation9]   ;;  %s265_s15 = int_to_ptr.vmem [resolvable:$true] %s264_s15 }
  0x15   : > { %s3143_s13 = scalar_select %p2735_p9, 1, 0 }
  0x16   : > { %p2233_p10 = pneg %p2735_p9  ;;  %s291_s18 = sshll.u32 %s2636_s17, 4  ;;  %s292_s18 = int_to_ptr.vmem [resolvable:$true] %s291_s18 }
  0x17   : > { %s2382_s20 = scalar_lea.vmem %s265_s15, 1024  ;;  %p2390_p5 = scmp.lt.s32.totalorder %s265_s15, %s265_s15 }
  0x18   : > { %p2743_p11 = pnand %p2233_p10, %p3124_p1  ;;  %p2383_p13 = scmp.ne.s32.totalorder %s265_s15, %s2382_s20 }
  0x19   : > { %p2391_p7 = scmp.lt.s32.totalorder %s2382_s20, %s2382_s20 }
  0x1a   : > { %s3144_s16 = scalar_select %p2743_p11, 1, 0 }
  0x1b   : > { %p2749_p12 = pneg %p2743_p11  ;;  %p2392_p10 = por %p2391_p7, %p2390_p5 }
  0x1d   : > { %p2385_p0 = pnand %p2383_p13, %p2749_p12 }
  0x1f   : > { %p2386_p3 = pneg %p2385_p0 }
  0x21   : > { %p2393_p8 = pnand %p2392_p10, %p2386_p3 }
  0x23   : > { %2396 = shalt.err (!%p2393_p8)
}
  0x24   : > { %s3125_s21 = smov 256   ;;  %s3126_s22 = smov 16  }
  0x25   : > { %s3146_s1 = sld [smem:[#allocation23_spill]]  ;;  %s2408_s25 = scalar_lea.vmem %s292_s18, 64 }
  0x26   : > { %p2409_p13 = scmp.ne.s32.totalorder %s292_s18, %s2408_s25  ;;  %p2416_p5 = scmp.lt.s32.totalorder %s292_s18, %s292_s18 }
  0x27   : > { %p2417_p3 = scmp.lt.s32.totalorder %s2408_s25, %s2408_s25 }
  0x28   : > { %p2411_p0 = pnand %p2409_p13, %p2749_p12 }
  0x29   : > { %p2418_p8 = por %p2417_p3, %p2416_p5 }
  0x2a   : > { %p2412_p1 = pneg %p2411_p0 }
  0x2b   : > { %2239 = dma.hbm_to_vmem [thread:$0]  (!%p2743_p11), %s3146_s1, 1024, %s265_s15, [#allocation7], %s3125_s21, %s3125_s21, %s3126_s22  }
  0x2c   : > { %p2419_p7 = pnand %p2418_p8, %p2412_p1 }
  0x2e   : > { %2422 = shalt.err (!%p2419_p7)
}
  0x2f   : > { %s3147_s3 = sld [smem:[#allocation24_spill]]  ;;  %s2771_s14 = sadd.s32 1, %s2633_s30  }
  0x30   : > { %3148 = sst [smem:[#allocation21_spill]] %s2771_s14  ;;  %s139_s15 = sadd.s32 1, %s2629_s29 }
  0x31   : > { %s136_s17 = ssub.s32 %s2633_s30, %s2771_s14  ;;  %p146_p1 = scmp.ne.s32.totalorder %s2629_s29, %s2625_s28 }
  0x32   : > { %p137_p10 = scmp.eq.s32.totalorder %s136_s17, 0  ;;  %p147_p13 = scmp.eq.s32.totalorder %s2633_s30, 0 }
  0x33   : > { %p2781_p0 = por %p228_p2, %p146_p1  ;;  %p2265_p5 = scmp.lt.s32.totalorder %s2633_s30, 4 }
  0x34   : > { %s2787_s23 = scalar_select %p137_p10, %s2629_s29, %s139_s15  }
  0x35   : > { %2245 = dma.hbm_to_vmem [thread:$0]  (!%p2743_p11), %s3147_s3, 64, %s292_s18, [#allocation10]  }
  0x36   : > { %s3149_s20 = scalar_select %p2781_p0, 1, 0 }
  0x37   : > { %3150 = sst [smem:[#allocation22_spill]] %s2787_s23  ;;  %p148_p3 = por %p147_p13, %p146_p1 }
  0x38   : > { %s313_s24 = sand.u32 1, %s2633_s30   ;;  %s3127_s25 = sand.u32 1, %s2629_s29  }
  0x39   : > { %s2180_s18 = sshll.u32 %s3127_s25, 9  ;;  %s2204_s26 = sshll.u32 %s2633_s30, 7 }
  0x3a   : > { %s3151_s5 = sld [smem:[#allocation25_spill]]  ;;  %s317_s17 = scalar_lea.vmem [#allocation12], %s2180_s18 }
  0x3b   : > { %s324_s1 = sshll.u32 %s317_s17, 4  ;;  %p2799_p2 = pnand %p2265_p5, %p148_p3  ;;  %s2803_s1 = int_to_ptr.vmem [resolvable:$true] %s324_s1 }
  0x3c   : > { %s2805_s15 = scalar_lea.sflag [#allocation13], %s313_s24 }
  0x3d   : > { %s3152_s3 = scalar_select %p2799_p2, 1, 0 }
  0x3e   : > { %p3135_p7 = pneg %p2799_p2 }
  0x40   : > { %s2797_s22 = scalar_lea.hbm %s3151_s5, %s2204_s26  ;;  %s2428_s26 = scalar_lea.hbm %s3151_s5, 32768 }
  0x41   : > { %s2423_s25 = scalar_lea.hbm %s2797_s22, 8192  ;;  %p2429_p13 = scmp.lt.s32.totalorder %s2797_s22, %s3151_s5 }
  0x42   : > { %p2424_p8 = scmp.ne.s32.totalorder %s2797_s22, %s2423_s25  ;;  %p2430_p5 = scmp.lt.s32.totalorder %s2428_s26, %s2423_s25 }
  0x44   : > { %p2426_p1 = pnand %p3135_p7, %p2424_p8  ;;  %p2431_p3 = por %p2430_p5, %p2429_p13 }
  0x46   : > { %p2427_p10 = pneg %p2426_p1 }
  0x48   : > { %p2432_p6 = pnand %p2431_p3, %p2427_p10 }
  0x4a   : > { %2435 = shalt.err (!%p2432_p6)
}
  0x4b   : > { %s2436_s24 = scalar_lea.vmem %s2803_s1, 8192  ;;  %s2639_s21 = smov [#allocation12]  }
  0x4c   : > { %p2437_p0 = scmp.ne.s32.totalorder %s2803_s1, %s2436_s24  ;;  %s2441_s18 = sshll.u32 %s2639_s21, 4  ;;  %s2442_s18 = int_to_ptr.vmem [resolvable:$false] %s2441_s18 }
  0x4d   : > { %s2443_s23 = scalar_lea.vmem %s2442_s18, 16384  ;;  %p2444_p4 = scmp.lt.s32.totalorder %s2803_s1, %s2442_s18 }
  0x4e   : > { %p2439_p8 = pnand %p2437_p0, %p3135_p7  ;;  %p2445_p9 = scmp.lt.s32.totalorder %s2443_s23, %s2436_s24 }
  0x50   : > { %p2440_p1 = pneg %p2439_p8  ;;  %p2446_p11 = por %p2445_p9, %p2444_p4 }
  0x52   : > { %p2447_p13 = pnand %p2446_p11, %p2440_p1 }
  0x54   : > { %2450 = shalt.err (!%p2447_p13)
}
  0x55   : > { %s2640_s25 = smov 512   ;;  %s2641_s26 = smov 128  }
  0x56   : > { %s2642_s10 = smov 8   ;;  %s2643_s17 = smov [#allocation3]  }
  0x57   : > { %2252 = dma.hbm_to_vmem [thread:$0]  (!%p2799_p2), %s2797_s22, 8192, %s2803_s1, %s2805_s15, %s2640_s25, %s2641_s26, %s2642_s10  }
  0x58   : > { %s254_s5 = sshll.u32 %s2643_s17, 4  ;;  %s2644_s21 = smov [#allocation8]   ;;  %s255_s5 = int_to_ptr.vmem [resolvable:$true] %s254_s5 }
  0x59   : > { %s277_s14 = sshll.u32 %s2644_s21, 4  ;;  %s2462_s18 = scalar_lea.vmem %s255_s5, 128  ;;  %s278_s14 = int_to_ptr.vmem [resolvable:$true] %s277_s14 }
  0x5a   : > { %p2463_p6 = scmp.ne.s32.totalorder %s255_s5, %s2462_s18  ;;  %p2470_p11 = scmp.lt.s32.totalorder %s255_s5, %s255_s5 }
  0x5b   : > { %p2471_p0 = scmp.lt.s32.totalorder %s2462_s18, %s2462_s18 }
  0x5c   : > { %p2465_p4 = pnand %p2463_p6, %p2749_p12 }
  0x5d   : > { %p2472_p10 = por %p2471_p0, %p2470_p11 }
  0x5e   : > { %p2466_p9 = pneg %p2465_p4 }
  0x60   : > { %p2473_p5 = pnand %p2472_p10, %p2466_p9 }
  0x62   : > { %2476 = shalt.err (!%p2473_p5)
}
  0x63   : > { %p3153_p3 = scmp.ne.s32.totalorder %s3144_s16, 0  ;;  %s2488_s1 = scalar_lea.vmem %s278_s14, 16384 }
  0x64   : > { %p2489_p8 = scmp.ne.s32.totalorder %s278_s14, %s2488_s1  ;;  %p2496_p6 = scmp.lt.s32.totalorder %s278_s14, %s278_s14 }
  0x65   : > { %2236 = dma.hbm_to_vmem [thread:$0]  (!%p3153_p3), %s3115_s0, 128, %s255_s5, [#allocation4]  }
  0x66   : > { %p2491_p1 = pnand %p2489_p8, %p2749_p12  ;;  %p2497_p4 = scmp.lt.s32.totalorder %s2488_s1, %s2488_s1 }
  0x68   : > { %p2492_p13 = pneg %p2491_p1  ;;  %p2498_p7 = por %p2497_p4, %p2496_p6 }
  0x6a   : > { %p2499_p2 = pnand %p2498_p7, %p2492_p13 }
  0x6c   : > { %2502 = shalt.err (!%p2499_p2)
}
  0x6d   : > { %s3154_s22 = smov 16   ;;  %s3155_s25 = smov 256  }
  0x6e   : > { %2242 = dma.hbm_to_vmem [thread:$0]  (!%p3153_p3), %s3117_s2, 16384, %s278_s14, [#allocation7], %s3155_s25, %s3155_s25, %s3154_s22  }
  0x6f   : > { %s2645_s5 = smov [#allocation11]   ;;  %s3156_s21 = sand.u32 1, %s2629_s29  }
  0x70   : > { %s302_s17 = sshll.u32 %s2645_s5, 4  ;;  %s2183_s18 = sshll.u32 %s3156_s21, 1  ;;  %s303_s17 = int_to_ptr.vmem [resolvable:$true] %s302_s17 }
  0x71   : > { %s2514_s23 = scalar_lea.vmem %s303_s17, 64  ;;  %p2522_p11 = scmp.lt.s32.totalorder %s303_s17, %s303_s17 }
  0x72   : > { %p2515_p9 = scmp.ne.s32.totalorder %s303_s17, %s2514_s23  ;;  %p2523_p0 = scmp.lt.s32.totalorder %s2514_s23, %s2514_s23 }
  0x74   : > { %p2517_p2 = pnand %p2515_p9, %p2749_p12  ;;  %p2524_p10 = por %p2523_p0, %p2522_p11 }
  0x76   : > { %p2518_p7 = pneg %p2517_p2 }
  0x78   : > { %p2525_p5 = pnand %p2524_p10, %p2518_p7 }
  0x7a   : > { %2528 = shalt.err (!%p2525_p5)
}
  0x7b   : > { %2248 = dma.hbm_to_vmem [thread:$0]  (!%p3153_p3), %s3119_s4, 64, %s303_s17, [#allocation10]  }
  0x7c   : > { %s2205_s14 = sshll.u32 %s2633_s30, 5  ;;  %s346_s22 = scalar_lea.vmem [#allocation14], %s2183_s18 }
  0x7d   : > { %s354_s25 = sshll.u32 %s346_s22, 4  ;;  %s352_s10 = scalar_lea.hbm %s3122_s7, %s2205_s14  ;;  %s355_s25 = int_to_ptr.vmem [resolvable:$true] %s354_s25 }
  0x7e   : > { %s2529_s5 = scalar_lea.hbm %s352_s10, 32  ;;  %p3157_p8 = scmp.ne.s32.totalorder %s3152_s3, 0 }
  0x7f   : > { %p2530_p12 = scmp.ne.s32.totalorder %s352_s10, %s2529_s5  ;;  %s2534_s23 = scalar_lea.hbm %s3122_s7, 128 }
  0x80   : > { %p3158_p1 = pneg %p3157_p8  ;;  %p2535_p3 = scmp.lt.s32.totalorder %s352_s10, %s3122_s7 }
  0x81   : > { %p2536_p4 = scmp.lt.s32.totalorder %s2534_s23, %s2529_s5 }
  0x82   : > { %p2532_p13 = pnand %p2530_p12, %p3158_p1 }
  0x83   : > { %p2537_p9 = por %p2536_p4, %p2535_p3 }
  0x84   : > { %p2533_p6 = pneg %p2532_p13 }
  0x86   : > { %p2538_p2 = pnand %p2537_p9, %p2533_p6 }
  0x88   : > { %2541 = shalt.err (!%p2538_p2)
}
  0x89   : > { %s2542_s18 = scalar_lea.vmem %s355_s25, 32  ;;  %p3159_p11 = pmov %p3158_p1 }
  0x8a   : > { %p2543_p7 = scmp.ne.s32.totalorder %s355_s25, %s2542_s18  ;;  %s2646_s1 = smov [#allocation14]  }
  0x8b   : > { %s2547_s14 = sshll.u32 %s2646_s1, 4  ;;  %s2548_s14 = int_to_ptr.vmem [resolvable:$false] %s2547_s14 }
  0x8c   : > { %p2545_p0 = pnand %p2543_p7, %p3159_p11  ;;  %s2549_s22 = scalar_lea.vmem %s2548_s14, 64 }
  0x8d   : > { %p2550_p5 = scmp.lt.s32.totalorder %s355_s25, %s2548_s14  ;;  %p2551_p12 = scmp.lt.s32.totalorder %s2549_s22, %s2542_s18 }
  0x8e   : > { %p2546_p10 = pneg %p2545_p0 }
  0x8f   : > { %p2552_p1 = por %p2551_p12, %p2550_p5 }
  0x91   : > { %p2553_p13 = pnand %p2552_p1, %p2546_p10 }
  0x93   : > { %2556 = shalt.err (!%p2553_p13)
}
  0x94   : > { %2255 = dma.hbm_to_vmem [thread:$0]  (!%p3157_p8), %s352_s10, 32, %s355_s25, %s2805_s15  }
  0x95   : > { %p3160_p6 = scmp.ne.s32.totalorder %s3143_s13, 0 }
  0x96   : > { %p3161_p3 = scmp.eq.s32.totalorder (!%p3160_p6), %s2715_s9, 0 }
  0x97   : > { %363 = sbr.rel (%p3160_p6) target bundleno = 1151 (0x47f), region = 52 }
  0x9c   : > { %2600 = dma.done.wait (%p3161_p3), [#allocation4], 128   ;;  %p3162_p4 = pmov %p3161_p3 }
  0x9d   : > { %p3163_p9 = pmov %p3161_p3 }
  0x9e   : > { %2602 = vsyncadd (%p3162_p4), [#allocation4], 4294967168 }
  0x9f   : > { %2604 = dma.done.wait (%p3163_p9), [#allocation7], 17408   ;;  %p3164_p2 = pmov %p3161_p3 }
  0xa1   : > { %2606 = vsyncadd (%p3164_p2), [#allocation7], 4294949888  ;;  %p3165_p7 = pmov %p3164_p2 }
  0xa2   : > { %p3166_p8 = pmov %p3164_p2 }
  0xa3   : > { %2608 = dma.done.wait (%p3165_p7), [#allocation10], 128  }
  0xa4   : > { %2610 = vsyncadd (%p3166_p8), [#allocation10], 4294967168  ;;  %s385_s3 = sand.u32 1, %s2715_s9   ;;  %s2893_s13 = sand.u32 1, %s2625_s28  }
  0xa5   : > { %s2192_s15 = sshll.u32 %s2893_s13, 9  ;;  %s386_s25 = scalar_lea.sflag [#allocation13], %s385_s3 }
  0xa6   : > { %s2896_s26 = scalar_lea.vmem [#allocation12], %s2192_s15  ;;  %p3167_p11 = scmp.ne.s32.totalorder %s3141_s11, 0 }
  0xa8   : > { %2612 = dma.done.wait (%p3167_p11), %s386_s25, 8224  }
  0xa9   : > { %2614 = vsyncadd (%p3167_p11), %s386_s25, 4294959072  ;;  %s2193_s19 = sshll.u32 %s2893_s13, 1  ;;  %s2194_s10 = sshll.u32 %s2893_s13, 4 }
  0xaa   : > { %s2195_s5 = sshll.u32 %s2715_s9, 1  ;;  %s2911_s24 = scalar_lea.vmem [#allocation14], %s2193_s19 }
  0xab   : > { %p442_p0 = scmp.lt.s32.totalorder %s2195_s5, 7  ;;  %s2913_s17 = scalar_lea.vmem [#allocation15], %s2194_s10 }
  0xac   : > { %p3168_p10 = scmp.ne.s32.totalorder %s2715_s9, 0 }
  0xad   : > { %s3179_s5 = smov (!%p442_p0, %s2195_s5), 7 }
  0xae   : > { %s444_s23 = scalar_lea.vmem %s3121_s6, %s3179_s5  ;;  %451 = sbr.rel (%p3168_p10) target bundleno = 830 (0x33e), region = 84 }
  0xb3   : > { %v459_v0 = vld [vmem:[#allocation6 + $0x30] sm:$0xff]  ;;  %v460_v1 = vld [vmem:[#allocation6 + $0x38] sm:$0xff]  ;;  %v457_v2 = vld [vmem:[#allocation6 + $0x20] sm:$0xff]  ;;  %v2647_v10 = vmov 0.0   ;;  %vm477_vm0 = vcmask 261120  }
  0xb4   : > { %v474_v3 = vunpack.c.h.bf16 %v459_v0  ;;  %v476_v4 = vunpack.c.h.bf16 %v460_v1  ;;  %v473_v5 = vunpack.c.l.bf16 %v459_v0  ;;  %v475_v6 = vunpack.c.l.bf16 %v460_v1  ;;  %v458_v7 = vld [vmem:[#allocation6 + $0x28] sm:$0xff]  ;;  %v455_v8 = vld [vmem:[#allocation6 + $0x10] sm:$0xff]  ;;  %v456_v9 = vld [vmem:[#allocation6 + $0x18] sm:$0xff]  ;;  %545 = vmatprep.mubr.f32.mxu0 %v2647_v10  ;;  %616 = vmatprep.mubr.f32.mxu1 %v2647_v10 }
  0xb5   : > { %v470_v11 = vunpack.c.h.bf16 %v457_v2  ;;  %v472_v12 = vunpack.c.h.bf16 %v458_v7  ;;  %v469_v13 = vunpack.c.l.bf16 %v457_v2  ;;  %v471_v14 = vunpack.c.l.bf16 %v458_v7  ;;  %v453_v15 = vld [vmem:[#allocation6] sm:$0xff]  ;;  %v454_v16 = vld [vmem:[#allocation6 + $0x8] sm:$0xff]  ;;  %v452_v25 = vld [vmem:[#allocation3] sm:$0xff] }
  0xb6   : > { %505 = vmatprep.subr.mxu0 %v474_v3  ;;  %576 = vmatprep.subr.mxu1 %v476_v4  ;;  %v466_v17 = vunpack.c.h.bf16 %v455_v8  ;;  %v468_v18 = vunpack.c.h.bf16 %v456_v9  ;;  %v465_v19 = vunpack.c.l.bf16 %v455_v8  ;;  %v467_v20 = vunpack.c.l.bf16 %v456_v9  ;;  %v812_v26 = vld [vmem:[#allocation8 + $0xf0] sm:$0xff]  ;;  %v810_v32 = vld [vmem:[#allocation8 + $0xe0] sm:$0xff] }
  0xb7   : > { %506 = vmatpush1.msra.mxu0 %v473_v5  ;;  %577 = vmatpush1.msra.mxu1 %v475_v6  ;;  %v462_v21 = vunpack.c.h.bf16 %v453_v15  ;;  %v464_v22 = vunpack.c.h.bf16 %v454_v16  ;;  %v461_v23 = vunpack.c.l.bf16 %v453_v15  ;;  %v463_v24 = vunpack.c.l.bf16 %v454_v16  ;;  %v876_v27 = vld [vmem:[#allocation8 + $0x2f0] sm:$0xff]  ;;  %v874_v33 = vld [vmem:[#allocation8 + $0x2e0] sm:$0xff] }
  0xb8   : > { %507 = vmatprep.subr.mxu0 %v470_v11  ;;  %578 = vmatprep.subr.mxu1 %v472_v12  ;;  %v971_v28 = vunpack.c.h.bf16 %v812_v26  ;;  %v1099_v29 = vunpack.c.h.bf16 %v876_v27  ;;  %v970_v30 = vunpack.c.l.bf16 %v812_v26  ;;  %v1098_v31 = vunpack.c.l.bf16 %v876_v27  ;;  %v808_v38 = vld [vmem:[#allocation8 + $0xd0] sm:$0xff]  ;;  %v806_v44 = vld [vmem:[#allocation8 + $0xc0] sm:$0xff] }
  0xb9   : > { %508 = vmatpush1.msra.mxu0 %v469_v13  ;;  %579 = vmatpush1.msra.mxu1 %v471_v14  ;;  %v967_v34 = vunpack.c.h.bf16 %v810_v32  ;;  %v1095_v35 = vunpack.c.h.bf16 %v874_v33  ;;  %v966_v36 = vunpack.c.l.bf16 %v810_v32  ;;  %v1094_v37 = vunpack.c.l.bf16 %v874_v33  ;;  %v872_v39 = vld [vmem:[#allocation8 + $0x2d0] sm:$0xff]  ;;  %v870_v45 = vld [vmem:[#allocation8 + $0x2c0] sm:$0xff] }
  0xba   : > { %509 = vmatprep.subr.mxu0 %v466_v17  ;;  %580 = vmatprep.subr.mxu1 %v468_v18  ;;  %v963_v40 = vunpack.c.h.bf16 %v808_v38  ;;  %v1091_v41 = vunpack.c.h.bf16 %v872_v39  ;;  %v962_v42 = vunpack.c.l.bf16 %v808_v38  ;;  %v1090_v43 = vunpack.c.l.bf16 %v872_v39  ;;  %v804_v50 = vld [vmem:[#allocation8 + $0xb0] sm:$0xff]  ;;  %v802_v56 = vld [vmem:[#allocation8 + $0xa0] sm:$0xff] }
  0xbb   : > { %510 = vmatpush1.msra.mxu0 %v465_v19  ;;  %581 = vmatpush1.msra.mxu1 %v467_v20  ;;  %v959_v46 = vunpack.c.h.bf16 %v806_v44  ;;  %v1087_v47 = vunpack.c.h.bf16 %v870_v45  ;;  %v958_v48 = vunpack.c.l.bf16 %v806_v44  ;;  %v1086_v49 = vunpack.c.l.bf16 %v870_v45  ;;  %v868_v51 = vld [vmem:[#allocation8 + $0x2b0] sm:$0xff]  ;;  %v866_v57 = vld [vmem:[#allocation8 + $0x2a0] sm:$0xff] }
  0xbc   : > { %511 = vmatprep.subr.mxu0 %v462_v21  ;;  %582 = vmatprep.subr.mxu1 %v464_v22  ;;  %v955_v52 = vunpack.c.h.bf16 %v804_v50  ;;  %v1083_v53 = vunpack.c.h.bf16 %v868_v51  ;;  %v954_v54 = vunpack.c.l.bf16 %v804_v50  ;;  %v1082_v55 = vunpack.c.l.bf16 %v868_v51  ;;  %v800_v62 = vld [vmem:[#allocation8 + $0x90] sm:$0xff]  ;;  %v798_v4 = vld [vmem:[#allocation8 + $0x80] sm:$0xff] }
  0xbd   : > { %512 = vmatpush1.msra.mxu0 %v461_v23  ;;  %583 = vmatpush1.msra.mxu1 %v463_v24  ;;  %v951_v58 = vunpack.c.h.bf16 %v802_v56  ;;  %v1079_v59 = vunpack.c.h.bf16 %v866_v57  ;;  %v950_v60 = vunpack.c.l.bf16 %v802_v56  ;;  %v1078_v61 = vunpack.c.l.bf16 %v866_v57  ;;  %v864_v63 = vld [vmem:[#allocation8 + $0x290] sm:$0xff]  ;;  %v862_v5 = vld [vmem:[#allocation8 + $0x280] sm:$0xff] }
  0xbe   : > { %2197 = vmatmul.mubr.msk.f32.vlgmr.msra.gmra.mxu0 %vm477_vm0, %v452_v25  ;;  %2198 = vmatmul.mubr.msk.f32.vlgmr.msra.gmra.mxu1 %vm477_vm0, %v452_v25  ;;  %v947_v0 = vunpack.c.h.bf16 %v800_v62  ;;  %v1075_v1 = vunpack.c.h.bf16 %v864_v63  ;;  %v946_v2 = vunpack.c.l.bf16 %v800_v62  ;;  %v1074_v3 = vunpack.c.l.bf16 %v864_v63  ;;  %v796_v10 = vld [vmem:[#allocation8 + $0x70] sm:$0xff]  ;;  %v794_v16 = vld [vmem:[#allocation8 + $0x60] sm:$0xff] }
  0xbf   : > { %1166 = vmatprep.subr.mxu0 %v971_v28  ;;  %1237 = vmatprep.subr.mxu1 %v1099_v29  ;;  %v943_v6 = vunpack.c.h.bf16 %v798_v4  ;;  %v1071_v7 = vunpack.c.h.bf16 %v862_v5  ;;  %v942_v8 = vunpack.c.l.bf16 %v798_v4  ;;  %v1070_v9 = vunpack.c.l.bf16 %v862_v5  ;;  %v860_v11 = vld [vmem:[#allocation8 + $0x270] sm:$0xff]  ;;  %v858_v17 = vld [vmem:[#allocation8 + $0x260] sm:$0xff] }
  0xc0   : > { %1167 = vmatpush1.msra.mxu0 %v970_v30  ;;  %1238 = vmatpush1.msra.mxu1 %v1098_v31  ;;  %v939_v12 = vunpack.c.h.bf16 %v796_v10  ;;  %v1067_v13 = vunpack.c.h.bf16 %v860_v11  ;;  %v938_v14 = vunpack.c.l.bf16 %v796_v10  ;;  %v1066_v15 = vunpack.c.l.bf16 %v860_v11  ;;  %v792_v22 = vld [vmem:[#allocation8 + $0x50] sm:$0xff]  ;;  %v790_v28 = vld [vmem:[#allocation8 + $0x40] sm:$0xff] }
  0xc1   : > { %1168 = vmatprep.subr.mxu0 %v967_v34  ;;  %1239 = vmatprep.subr.mxu1 %v1095_v35  ;;  %v935_v18 = vunpack.c.h.bf16 %v794_v16  ;;  %v1063_v19 = vunpack.c.h.bf16 %v858_v17  ;;  %v934_v20 = vunpack.c.l.bf16 %v794_v16  ;;  %v1062_v21 = vunpack.c.l.bf16 %v858_v17  ;;  %v856_v23 = vld [vmem:[#allocation8 + $0x250] sm:$0xff]  ;;  %v854_v29 = vld [vmem:[#allocation8 + $0x240] sm:$0xff] }
  0xc2   : > { %1169 = vmatpush1.msra.mxu0 %v966_v36  ;;  %1240 = vmatpush1.msra.mxu1 %v1094_v37  ;;  %v931_v24 = vunpack.c.h.bf16 %v792_v22  ;;  %v1059_v25 = vunpack.c.h.bf16 %v856_v23  ;;  %v930_v26 = vunpack.c.l.bf16 %v792_v22  ;;  %v1058_v27 = vunpack.c.l.bf16 %v856_v23  ;;  %v788_v34 = vld [vmem:[#allocation8 + $0x30] sm:$0xff] }
  0xc3   : > { %1170 = vmatprep.subr.mxu0 %v963_v40  ;;  %1241 = vmatprep.subr.mxu1 %v1091_v41  ;;  %v927_v30 = vunpack.c.h.bf16 %v790_v28  ;;  %v1055_v31 = vunpack.c.h.bf16 %v854_v29  ;;  %v926_v32 = vunpack.c.l.bf16 %v790_v28  ;;  %v1054_v33 = vunpack.c.l.bf16 %v854_v29  ;;  %v852_v35 = vld [vmem:[#allocation8 + $0x230] sm:$0xff]  ;;  %v786_v40 = vld [vmem:[#allocation8 + $0x20] sm:$0xff] }
  0xc4   : > { %1171 = vmatpush1.msra.mxu0 %v962_v42  ;;  %1242 = vmatpush1.msra.mxu1 %v1090_v43  ;;  %v923_v36 = vunpack.c.h.bf16 %v788_v34  ;;  %v1051_v37 = vunpack.c.h.bf16 %v852_v35  ;;  %v922_v38 = vunpack.c.l.bf16 %v788_v34  ;;  %v1050_v39 = vunpack.c.l.bf16 %v852_v35  ;;  %v850_v41 = vld [vmem:[#allocation8 + $0x220] sm:$0xff] }
  0xc5   : > { %1172 = vmatprep.subr.mxu0 %v959_v46  ;;  %1243 = vmatprep.subr.mxu1 %v1087_v47  ;;  %v919_v42 = vunpack.c.h.bf16 %v786_v40  ;;  %v1047_v43 = vunpack.c.h.bf16 %v850_v41  ;;  %v918_v44 = vunpack.c.l.bf16 %v786_v40  ;;  %v1046_v45 = vunpack.c.l.bf16 %v850_v41  ;;  %v784_v46 = vld [vmem:[#allocation8 + $0x10] sm:$0xff] }
  0xc6   : > { %1173 = vmatpush1.msra.mxu0 %v958_v48  ;;  %1244 = vmatpush1.msra.mxu1 %v1086_v49  ;;  %v848_v47 = vld [vmem:[#allocation8 + $0x210] sm:$0xff]  ;;  %v915_v48 = vunpack.c.h.bf16 %v784_v46  ;;  %v914_v50 = vunpack.c.l.bf16 %v784_v46 }
  0xc7   : > { %1174 = vmatprep.subr.mxu0 %v955_v52  ;;  %1245 = vmatprep.subr.mxu1 %v1083_v53  ;;  %v1043_v49 = vunpack.c.h.bf16 %v848_v47  ;;  %v1042_v51 = vunpack.c.l.bf16 %v848_v47  ;;  %v782_v52 = vld [vmem:[#allocation8] sm:$0xff] }
  0xc8   : > { %1175 = vmatpush1.msra.mxu0 %v954_v54  ;;  %1246 = vmatpush1.msra.mxu1 %v1082_v55  ;;  %v846_v53 = vld [vmem:[#allocation8 + $0x200] sm:$0xff]  ;;  %v910_v54 = vunpack.c.l.bf16 %v782_v52  ;;  %v911_v55 = vunpack.c.h.bf16 %v782_v52 }
  0xc9   : > { %1176 = vmatprep.subr.mxu0 %v951_v58  ;;  %1247 = vmatprep.subr.mxu1 %v1079_v59  ;;  %v1038_v56 = vunpack.c.l.bf16 %v846_v53  ;;  %v1039_v57 = vunpack.c.h.bf16 %v846_v53  ;;  %v844_v58 = vld [vmem:[#allocation8 + $0x1f0] sm:$0xff] }
  0xca   : > { %1177 = vmatpush1.msra.mxu0 %v950_v60  ;;  %1248 = vmatpush1.msra.mxu1 %v1078_v61  ;;  %v908_v59 = vld [vmem:[#allocation8 + $0x3f0] sm:$0xff]  ;;  %v842_v60 = vld [vmem:[#allocation8 + $0x1e0] sm:$0xff]  ;;  %v1034_v61 = vunpack.c.l.bf16 %v844_v58  ;;  %v1035_v62 = vunpack.c.h.bf16 %v844_v58 }
  0xcb   : > { %1178 = vmatprep.subr.mxu0 %v947_v0  ;;  %1249 = vmatprep.subr.mxu1 %v1075_v1  ;;  %v1162_v63 = vunpack.c.l.bf16 %v908_v59  ;;  %v1163_v0 = vunpack.c.h.bf16 %v908_v59  ;;  %v906_v1 = vld [vmem:[#allocation8 + $0x3e0] sm:$0xff]  ;;  %v1031_v4 = vunpack.c.h.bf16 %v842_v60 }
  0xcc   : > { %1179 = vmatpush1.msra.mxu0 %v946_v2  ;;  %1250 = vmatpush1.msra.mxu1 %v1074_v3  ;;  %v840_v2 = vld [vmem:[#allocation8 + $0x1d0] sm:$0xff]  ;;  %v1159_v5 = vunpack.c.h.bf16 %v906_v1 }
  0xcd   : > { %1180 = vmatprep.subr.mxu0 %v943_v6  ;;  %1251 = vmatprep.subr.mxu1 %v1071_v7  ;;  %v904_v3 = vld [vmem:[#allocation8 + $0x3d0] sm:$0xff]  ;;  %v1030_v6 = vunpack.c.l.bf16 %v842_v60  ;;  %v1158_v7 = vunpack.c.l.bf16 %v906_v1  ;;  %v1027_v10 = vunpack.c.h.bf16 %v840_v2 }
  0xce   : > { %1181 = vmatpush1.msra.mxu0 %v942_v8  ;;  %1252 = vmatpush1.msra.mxu1 %v1070_v9  ;;  %v838_v8 = vld [vmem:[#allocation8 + $0x1c0] sm:$0xff]  ;;  %v1155_v11 = vunpack.c.h.bf16 %v904_v3 }
  0xcf   : > { %1182 = vmatprep.subr.mxu0 %v939_v12  ;;  %1253 = vmatprep.subr.mxu1 %v1067_v13  ;;  %v902_v9 = vld [vmem:[#allocation8 + $0x3c0] sm:$0xff]  ;;  %v1026_v12 = vunpack.c.l.bf16 %v840_v2  ;;  %v1154_v13 = vunpack.c.l.bf16 %v904_v3  ;;  %v1023_v16 = vunpack.c.h.bf16 %v838_v8 }
  0xd0   : > { %1183 = vmatpush1.msra.mxu0 %v938_v14  ;;  %1254 = vmatpush1.msra.mxu1 %v1066_v15  ;;  %v836_v14 = vld [vmem:[#allocation8 + $0x1b0] sm:$0xff]  ;;  %v1151_v17 = vunpack.c.h.bf16 %v902_v9 }
  0xd1   : > { %1184 = vmatprep.subr.mxu0 %v935_v18  ;;  %1255 = vmatprep.subr.mxu1 %v1063_v19  ;;  %v900_v15 = vld [vmem:[#allocation8 + $0x3b0] sm:$0xff]  ;;  %v1022_v18 = vunpack.c.l.bf16 %v838_v8  ;;  %v1150_v19 = vunpack.c.l.bf16 %v902_v9  ;;  %v1019_v22 = vunpack.c.h.bf16 %v836_v14 }
  0xd2   : > { %1185 = vmatpush1.msra.mxu0 %v934_v20  ;;  %1256 = vmatpush1.msra.mxu1 %v1062_v21  ;;  %v834_v20 = vld [vmem:[#allocation8 + $0x1a0] sm:$0xff]  ;;  %v1147_v23 = vunpack.c.h.bf16 %v900_v15 }
  0xd3   : > { %1186 = vmatprep.subr.mxu0 %v931_v24  ;;  %1257 = vmatprep.subr.mxu1 %v1059_v25  ;;  %v898_v21 = vld [vmem:[#allocation8 + $0x3a0] sm:$0xff]  ;;  %v1018_v24 = vunpack.c.l.bf16 %v836_v14  ;;  %v1146_v25 = vunpack.c.l.bf16 %v900_v15  ;;  %v1015_v28 = vunpack.c.h.bf16 %v834_v20 }
  0xd4   : > { %1187 = vmatpush1.msra.mxu0 %v930_v26  ;;  %1258 = vmatpush1.msra.mxu1 %v1058_v27  ;;  %v832_v26 = vld [vmem:[#allocation8 + $0x190] sm:$0xff]  ;;  %v1143_v29 = vunpack.c.h.bf16 %v898_v21 }
  0xd5   : > { %1188 = vmatprep.subr.mxu0 %v927_v30  ;;  %1259 = vmatprep.subr.mxu1 %v1055_v31  ;;  %v896_v27 = vld [vmem:[#allocation8 + $0x390] sm:$0xff]  ;;  %v1014_v30 = vunpack.c.l.bf16 %v834_v20  ;;  %v1142_v31 = vunpack.c.l.bf16 %v898_v21  ;;  %v1011_v34 = vunpack.c.h.bf16 %v832_v26 }
  0xd6   : > { %1189 = vmatpush1.msra.mxu0 %v926_v32  ;;  %1260 = vmatpush1.msra.mxu1 %v1054_v33  ;;  %v830_v32 = vld [vmem:[#allocation8 + $0x180] sm:$0xff]  ;;  %v1139_v35 = vunpack.c.h.bf16 %v896_v27 }
  0xd7   : > { %1190 = vmatprep.subr.mxu0 %v923_v36  ;;  %1261 = vmatprep.subr.mxu1 %v1051_v37  ;;  %v894_v33 = vld [vmem:[#allocation8 + $0x380] sm:$0xff]  ;;  %v1010_v36 = vunpack.c.l.bf16 %v832_v26  ;;  %v1138_v37 = vunpack.c.l.bf16 %v896_v27  ;;  %v1007_v40 = vunpack.c.h.bf16 %v830_v32  ;;  %v2917_v26 = vld [vmem:[#allocation8 + $0xf8] sm:$0xff] }
  0xd8   : > { %1191 = vmatpush1.msra.mxu0 %v922_v38  ;;  %1262 = vmatpush1.msra.mxu1 %v1050_v39  ;;  %v828_v38 = vld [vmem:[#allocation8 + $0x170] sm:$0xff]  ;;  %v1135_v41 = vunpack.c.h.bf16 %v894_v33  ;;  %v2919_v27 = vld [vmem:[#allocation8 + $0x2f8] sm:$0xff] }
  0xd9   : > { %1192 = vmatprep.subr.mxu0 %v919_v42  ;;  %1263 = vmatprep.subr.mxu1 %v1047_v43  ;;  %v892_v39 = vld [vmem:[#allocation8 + $0x370] sm:$0xff]  ;;  %v1006_v42 = vunpack.c.l.bf16 %v830_v32  ;;  %v1134_v43 = vunpack.c.l.bf16 %v894_v33  ;;  %v1003_v46 = vunpack.c.h.bf16 %v828_v38 }
  0xda   : > { %1193 = vmatpush1.msra.mxu0 %v918_v44  ;;  %1264 = vmatpush1.msra.mxu1 %v1046_v45  ;;  %v826_v44 = vld [vmem:[#allocation8 + $0x160] sm:$0xff]  ;;  %v1131_v47 = vunpack.c.h.bf16 %v892_v39 }
  0xdb   : > { %1194 = vmatprep.subr.mxu0 %v915_v48  ;;  %1265 = vmatprep.subr.mxu1 %v1043_v49  ;;  %v890_v45 = vld [vmem:[#allocation8 + $0x360] sm:$0xff]  ;;  %v1002_v48 = vunpack.c.l.bf16 %v828_v38  ;;  %v1130_v49 = vunpack.c.l.bf16 %v892_v39  ;;  %v999_v52 = vunpack.c.h.bf16 %v826_v44 }
  0xdc   : > { %1195 = vmatpush1.msra.mxu0 %v914_v50  ;;  %1266 = vmatpush1.msra.mxu1 %v1042_v51  ;;  %v824_v50 = vld [vmem:[#allocation8 + $0x150] sm:$0xff]  ;;  %v1127_v53 = vunpack.c.h.bf16 %v890_v45 }
  0xdd   : > { %1196 = vmatprep.subr.mxu0 %v911_v55  ;;  %1267 = vmatprep.subr.mxu1 %v1039_v57  ;;  %v888_v51 = vld [vmem:[#allocation8 + $0x350] sm:$0xff]  ;;  %v1126_v55 = vunpack.c.l.bf16 %v890_v45  ;;  %v886_v57 = vld [vmem:[#allocation8 + $0x340] sm:$0xff]  ;;  %v995_v58 = vunpack.c.h.bf16 %v824_v50  ;;  %v994_v60 = vunpack.c.l.bf16 %v824_v50 }
  0xde   : > { %1197 = vmatpush1.msra.mxu0 %v910_v54  ;;  %1268 = vmatpush1.msra.mxu1 %v1038_v56  ;;  %v998_v54 = vunpack.c.l.bf16 %v826_v44  ;;  %v822_v56 = vld [vmem:[#allocation8 + $0x140] sm:$0xff]  ;;  %v1123_v59 = vunpack.c.h.bf16 %v888_v51  ;;  %v1119_v1 = vunpack.c.h.bf16 %v886_v57  ;;  %v1118_v3 = vunpack.c.l.bf16 %v886_v57 }
  0xdf   : > { %1198 = vmatprep.subr.mxu0 %v1035_v62  ;;  %1269 = vmatprep.subr.mxu1 %v1163_v0  ;;  %v820_v62 = vld [vmem:[#allocation8 + $0x130] sm:$0xff]  ;;  %v991_v0 = vunpack.c.h.bf16 %v822_v56  ;;  %v990_v2 = vunpack.c.l.bf16 %v822_v56 }
  0xe0   : > { %1199 = vmatpush2.msra.mxu0 %v1034_v61  ;;  %1270 = vmatpush2.msra.mxu1 %v1162_v63  ;;  %v1122_v61 = vunpack.c.l.bf16 %v888_v51  ;;  %v884_v63 = vld [vmem:[#allocation8 + $0x330] sm:$0xff]  ;;  %v986_v8 = vunpack.c.l.bf16 %v820_v62 }
  0xe1   : > { %1200 = vmatprep.subr.mxu0 %v1031_v4  ;;  %1271 = vmatprep.subr.mxu1 %v1159_v5  ;;  %v818_v4 = vld [vmem:[#allocation8 + $0x120] sm:$0xff]  ;;  %v1114_v9 = vunpack.c.l.bf16 %v884_v63 }
  0xe2   : > { %1201 = vmatpush2.msra.mxu0 %v1030_v6  ;;  %1272 = vmatpush2.msra.mxu1 %v1158_v7  ;;  %v882_v5 = vld [vmem:[#allocation8 + $0x320] sm:$0xff]  ;;  %v987_v6 = vunpack.c.h.bf16 %v820_v62  ;;  %v1115_v7 = vunpack.c.h.bf16 %v884_v63  ;;  %v982_v14 = vunpack.c.l.bf16 %v818_v4 }
  0xe3   : > { %1202 = vmatprep.subr.mxu0 %v1027_v10  ;;  %1273 = vmatprep.subr.mxu1 %v1155_v11  ;;  %v816_v10 = vld [vmem:[#allocation8 + $0x110] sm:$0xff]  ;;  %v1110_v15 = vunpack.c.l.bf16 %v882_v5 }
  0xe4   : > { %1203 = vmatpush2.msra.mxu0 %v1026_v12  ;;  %1274 = vmatpush2.msra.mxu1 %v1154_v13  ;;  %v880_v11 = vld [vmem:[#allocation8 + $0x310] sm:$0xff]  ;;  %v983_v12 = vunpack.c.h.bf16 %v818_v4  ;;  %v1111_v13 = vunpack.c.h.bf16 %v882_v5  ;;  %v978_v20 = vunpack.c.l.bf16 %v816_v10 }
  0xe5   : > { %1204 = vmatprep.subr.mxu0 %v1023_v16  ;;  %1275 = vmatprep.subr.mxu1 %v1151_v17  ;;  %v814_v16 = vld [vmem:[#allocation8 + $0x100] sm:$0xff]  ;;  %v1106_v21 = vunpack.c.l.bf16 %v880_v11 }
  0xe6   : > { %1205 = vmatpush2.msra.mxu0 %v1022_v18  ;;  %1276 = vmatpush2.msra.mxu1 %v1150_v19  ;;  %v878_v17 = vld [vmem:[#allocation8 + $0x300] sm:$0xff]  ;;  %v979_v18 = vunpack.c.h.bf16 %v816_v10  ;;  %v1107_v19 = vunpack.c.h.bf16 %v880_v11 }
  0xe7   : > { %1206 = vmatprep.subr.mxu0 %v1019_v22  ;;  %1277 = vmatprep.subr.mxu1 %v1147_v23  ;;  %v975_v22 = vunpack.c.h.bf16 %v814_v16  ;;  %v1103_v23 = vunpack.c.h.bf16 %v878_v17 }
  0xe8   : > { %1207 = vmatpush2.msra.mxu0 %v1018_v24  ;;  %1278 = vmatpush2.msra.mxu1 %v1146_v25  ;;  %v974_v24 = vunpack.c.l.bf16 %v814_v16  ;;  %v1102_v25 = vunpack.c.l.bf16 %v878_v17 }
  0xe9   : > { %1208 = vmatprep.subr.mxu0 %v1015_v28  ;;  %1279 = vmatprep.subr.mxu1 %v1143_v29  ;;  %v973_v28 = vunpack.c.h.bf16 %v2917_v26  ;;  %v1101_v29 = vunpack.c.h.bf16 %v2919_v27 }
  0xea   : > { %1209 = vmatpush2.msra.mxu0 %v1014_v30  ;;  %1280 = vmatpush2.msra.mxu1 %v1142_v31 }
  0xeb   : > { %1210 = vmatprep.subr.mxu0 %v1011_v34  ;;  %1281 = vmatprep.subr.mxu1 %v1139_v35 }
  0xec   : > { %1211 = vmatpush2.msra.mxu0 %v1010_v36  ;;  %1282 = vmatpush2.msra.mxu1 %v1138_v37 }
  0xed   : > { %1212 = vmatprep.subr.mxu0 %v1007_v40  ;;  %1283 = vmatprep.subr.mxu1 %v1135_v41 }
  0xee   : > { %1213 = vmatpush2.msra.mxu0 %v1006_v42  ;;  %1284 = vmatpush2.msra.mxu1 %v1134_v43 }
  0xef   : > { %1214 = vmatprep.subr.mxu0 %v1003_v46  ;;  %1285 = vmatprep.subr.mxu1 %v1131_v47 }
  0xf0   : > { %1215 = vmatpush2.msra.mxu0 %v1002_v48  ;;  %1286 = vmatpush2.msra.mxu1 %v1130_v49 }
  0xf1   : > { %1216 = vmatprep.subr.mxu0 %v999_v52  ;;  %1287 = vmatprep.subr.mxu1 %v1127_v53 }
  0xf2   : > { %1217 = vmatpush2.msra.mxu0 %v998_v54  ;;  %1288 = vmatpush2.msra.mxu1 %v1126_v55 }
  0xf3   : > { %1218 = vmatprep.subr.mxu0 %v995_v58  ;;  %1289 = vmatprep.subr.mxu1 %v1123_v59 }
  0xf4   : > { %1219 = vmatpush2.msra.mxu0 %v994_v60  ;;  %1290 = vmatpush2.msra.mxu1 %v1122_v61 }
  0xf5   : > { %1220 = vmatprep.subr.mxu0 %v991_v0  ;;  %1291 = vmatprep.subr.mxu1 %v1119_v1 }
  0xf6   : > { %1221 = vmatpush2.msra.mxu0 %v990_v2  ;;  %1292 = vmatpush2.msra.mxu1 %v1118_v3 }
  0xf7   : > { %1222 = vmatprep.subr.mxu0 %v987_v6  ;;  %1293 = vmatprep.subr.mxu1 %v1115_v7 }
  0xf8   : > { %1223 = vmatpush2.msra.mxu0 %v986_v8  ;;  %1294 = vmatpush2.msra.mxu1 %v1114_v9 }
  0xf9   : > { %1224 = vmatprep.subr.mxu0 %v983_v12  ;;  %1295 = vmatprep.subr.mxu1 %v1111_v13 }
  0xfa   : > { %1225 = vmatpush2.msra.mxu0 %v982_v14  ;;  %1296 = vmatpush2.msra.mxu1 %v1110_v15 }
  0xfb   : > { %1226 = vmatprep.subr.mxu0 %v979_v18  ;;  %1297 = vmatprep.subr.mxu1 %v1107_v19 }
  0xfc   : > { %1227 = vmatpush2.msra.mxu0 %v978_v20  ;;  %1298 = vmatpush2.msra.mxu1 %v1106_v21 }
  0xfd   : > { %1228 = vmatprep.subr.mxu0 %v975_v22  ;;  %1299 = vmatprep.subr.mxu1 %v1103_v23 }
  0xfe   : > { %1229 = vmatpush2.msra.mxu0 %v974_v24  ;;  %1300 = vmatpush2.msra.mxu1 %v1102_v25 }
  0xff   : > { %1308 = vmatprep.subr.mxu0 %v973_v28  ;;  %1379 = vmatprep.subr.mxu1 %v1101_v29 }
 0x17e   : > { %v547_v30 = vpop.f32.mrf.mxu0  ;;  %v618_v31 = vpop.f32.mrf.mxu1 }
 0x17f   : > { %v623_v32 = vrot.slane %v547_v30, 4  ;;  %v635_v33 = vrot.slane %v618_v31, 4 }
 0x180   : > { %v549_v34 = vpop.f32.mrf.mxu0  ;;  %v620_v35 = vpop.f32.mrf.mxu1 }
 0x181   : > { %v624_v36 = vadd.f32 %v623_v32, %v547_v30  ;;  %v636_v37 = vadd.f32 %v635_v33, %v618_v31  ;;  %v629_v38 = vrot.slane %v549_v34, 4  ;;  %v641_v39 = vrot.slane %v620_v35, 4 }
 0x183   : > { %v625_v40 = vrot.slane %v624_v36, 2  ;;  %v637_v41 = vrot.slane %v636_v37, 2  ;;  %v630_v42 = vadd.f32 %v629_v38, %v549_v34  ;;  %v642_v43 = vadd.f32 %v641_v39, %v620_v35 }
 0x184   : > { %v702_v38 = vlaneseq }
 0x185   : > { %v626_v44 = vadd.f32 %v625_v40, %v624_v36  ;;  %v638_v45 = vadd.f32 %v637_v41, %v636_v37  ;;  %v631_v46 = vrot.slane %v630_v42, 2  ;;  %v643_v47 = vrot.slane %v642_v43, 2 }
 0x186   : > { %v2923_v41 = vshrl.u32 %v702_v38, 7 }
 0x187   : > { %v627_v48 = vrot.slane %v626_v44, 1  ;;  %v639_v49 = vrot.slane %v638_v45, 1  ;;  %v632_v50 = vadd.f32 %v631_v46, %v630_v42  ;;  %v644_v51 = vadd.f32 %v643_v47, %v642_v43  ;;  %v700_v43 = vld [vmem:[#allocation9] sm:$0xf] }
 0x188   : > { %v704_v42 = vsub.s32 0, %v2923_v41  ;;  %v716_v46 = vsub.s32 3, %v2923_v41 }
 0x189   : > { %v628_v52 = vadd.f32 %v627_v48, %v626_v44  ;;  %v640_v53 = vadd.f32 %v639_v49, %v638_v45  ;;  %v633_v54 = vrot.slane %v632_v50, 1  ;;  %v645_v55 = vrot.slane %v644_v51, 1 }
 0x18a   : > { %v712_v44 = vsub.s32 2, %v2923_v41  ;;  %v708_v45 = vsub.s32 1, %v2923_v41  ;;  %v705_v47 = vrot.slane %v700_v43, %v704_v42 }
 0x18b   : > { %v648_v56 = vmul.f32 0.125, %v628_v52  ;;  %v650_v57 = vmul.f32 0.125, %v640_v53  ;;  %v634_v58 = vadd.f32 %v633_v54, %v632_v50  ;;  %v646_v59 = vadd.f32 %v645_v55, %v644_v51 }
 0x18c   : > { %v713_v49 = vrot.slane %v700_v43, %v712_v44  ;;  %v709_v52 = vrot.slane %v700_v43, %v708_v45  ;;  %v717_v55 = vrot.slane %v700_v43, %v716_v46 }
 0x18d   : > { %v652_v60 = vsub.f32 %v547_v30, %v648_v56  ;;  %v654_v61 = vsub.f32 %v618_v31, %v650_v57  ;;  %v649_v62 = vmul.f32 0.125, %v634_v58  ;;  %v651_v63 = vmul.f32 0.125, %v646_v59 }
 0x18f   : > { %v656_v0 = vmul.f32 %v652_v60, %v652_v60  ;;  %v658_v1 = vmul.f32 %v654_v61, %v654_v61  ;;  %v653_v2 = vsub.f32 %v549_v34, %v649_v62  ;;  %v655_v3 = vsub.f32 %v620_v35, %v651_v63 }
 0x191   : > { %v660_v4 = vrot.slane %v656_v0, 4  ;;  %v672_v5 = vrot.slane %v658_v1, 4  ;;  %v657_v6 = vmul.f32 %v653_v2, %v653_v2  ;;  %v659_v7 = vmul.f32 %v655_v3, %v655_v3 }
 0x193   : > { %v661_v8 = vadd.f32 %v660_v4, %v656_v0  ;;  %v673_v9 = vadd.f32 %v672_v5, %v658_v1  ;;  %v666_v10 = vrot.slane %v657_v6, 4  ;;  %v678_v11 = vrot.slane %v659_v7, 4 }
 0x195   : > { %v662_v12 = vrot.slane %v661_v8, 2  ;;  %v674_v13 = vrot.slane %v673_v9, 2  ;;  %v667_v14 = vadd.f32 %v666_v10, %v657_v6  ;;  %v679_v15 = vadd.f32 %v678_v11, %v659_v7 }
 0x197   : > { %v663_v16 = vadd.f32 %v662_v12, %v661_v8  ;;  %v675_v17 = vadd.f32 %v674_v13, %v673_v9  ;;  %v668_v18 = vrot.slane %v667_v14, 2  ;;  %v680_v19 = vrot.slane %v679_v15, 2 }
 0x199   : > { %v664_v20 = vrot.slane %v663_v16, 1  ;;  %v676_v21 = vrot.slane %v675_v17, 1  ;;  %v669_v22 = vadd.f32 %v668_v18, %v667_v14  ;;  %v681_v23 = vadd.f32 %v680_v19, %v679_v15 }
 0x19b   : > { %v665_v24 = vadd.f32 %v664_v20, %v663_v16  ;;  %v677_v25 = vadd.f32 %v676_v21, %v675_v17  ;;  %v670_v28 = vrot.slane %v669_v22, 1  ;;  %v682_v29 = vrot.slane %v681_v23, 1  ;;  %v2949_v20 = vld [vmem:[#allocation8 + $0xe8] sm:$0xff] }
 0x19d   : > { %v684_v30 = vmul.f32 0.125, %v665_v24  ;;  %v686_v31 = vmul.f32 0.125, %v677_v25  ;;  %v671_v32 = vadd.f32 %v670_v28, %v669_v22  ;;  %v683_v33 = vadd.f32 %v682_v29, %v681_v23  ;;  %v2951_v23 = vld [vmem:[#allocation8 + $0x2e8] sm:$0xff] }
 0x19e   : > { %v972_v29 = vunpack.c.l.bf16 %v2917_v26  ;;  %v1097_v38 = vunpack.c.h.bf16 %v2951_v23  ;;  %v793_v26 = vld [vmem:[#allocation8 + $0x58] sm:$0xff] }
 0x19f   : > { %v688_v34 = vadd.f32 1e-06, %v684_v30  ;;  %v690_v35 = vadd.f32 1e-06, %v686_v31  ;;  %v685_v36 = vmul.f32 0.125, %v671_v32  ;;  %v687_v37 = vmul.f32 0.125, %v683_v33 }
 0x1a0   : > { %v1100_v30 = vunpack.c.l.bf16 %v2919_v27 }
 0x1a1   : > { %2315 = vrsqrt.f32 %v688_v34  ;;  %v689_v39 = vadd.f32 1e-06, %v685_v36  ;;  %v691_v40 = vadd.f32 1e-06, %v687_v37  ;;  %v969_v34 = vunpack.c.h.bf16 %v2949_v20 }
 0x1a2   : > { %2317 = vrsqrt.f32 %v690_v35 }
 0x1a3   : > { %2319 = vrsqrt.f32 %v689_v39 }
 0x1a4   : > { %2321 = vrsqrt.f32 %v691_v40 }
 0x1ae   : > { %v2316_v48 = vpop.eup %2315 }
 0x1af   : > { %v2318_v50 = vpop.eup %2317  ;;  %v696_v51 = vmul.f32 %v2316_v48, %v652_v60 }
 0x1b0   : > { %v2320_v53 = vpop.eup %2319  ;;  %v698_v54 = vmul.f32 %v2318_v50, %v654_v61 }
 0x1b1   : > { %v2322_v56 = vpop.eup %2321  ;;  %v2937_v57 = vadd.f32 %v705_v47, %v696_v51  ;;  %v697_v58 = vmul.f32 %v2320_v53, %v653_v2 }
 0x1b2   : > { %v2939_v59 = vadd.f32 %v713_v49, %v698_v54  ;;  %v699_v62 = vmul.f32 %v2322_v56, %v655_v3 }
 0x1b3   : > { %v730_v63 = vmin.f32 %v2937_v57, 20.0  ;;  %v2942_v0 = vadd.f32 %v709_v52, %v697_v58  ;;  %vm726_vm1 = vcmp.gt.f32.partialorder %v2937_v57, 20.0 }
 0x1b4   : > { %v732_v60 = vmin.f32 %v2939_v59, 20.0  ;;  %v2945_v1 = vadd.f32 %v717_v55, %v699_v62  ;;  %v809_v55 = vld [vmem:[#allocation8 + $0xd8] sm:$0xff]  ;;  %vm728_vm8 = vcmp.gt.f32.partialorder %v2939_v59, 20.0 }
 0x1b5   : > { %v734_v4 = vmul.f32 1.442695, %v730_v63  ;;  %v731_v61 = vmin.f32 %v2942_v0, 20.0  ;;  %vm727_vm2 = vcmp.gt.f32.partialorder %v2942_v0, 20.0  ;;  %v873_v63 = vld [vmem:[#allocation8 + $0x2d8] sm:$0xff] }
 0x1b6   : > { %v738_v5 = vmul.f32 1.442695, %v732_v60  ;;  %v733_v6 = vmin.f32 %v2945_v1, 20.0  ;;  %vm729_vm6 = vcmp.gt.f32.partialorder %v2945_v1, 20.0  ;;  %v968_v60 = vunpack.c.l.bf16 %v2949_v20 }
 0x1b7   : > { %2323 = vpow2.f32 %v734_v4  ;;  %v736_v7 = vmul.f32 1.442695, %v731_v61  ;;  %v807_v4 = vld [vmem:[#allocation8 + $0xc8] sm:$0xff] }
 0x1b8   : > { %2325 = vpow2.f32 %v738_v5  ;;  %v740_v2 = vmul.f32 1.442695, %v733_v6  ;;  %v871_v61 = vld [vmem:[#allocation8 + $0x2c8] sm:$0xff]  ;;  %v964_v5 = vunpack.c.l.bf16 %v809_v55  ;;  %v1093_v6 = vunpack.c.h.bf16 %v873_v63 }
 0x1b9   : > { %2327 = vpow2.f32 %v736_v7  ;;  %v805_v7 = vld [vmem:[#allocation8 + $0xb8] sm:$0xff] }
 0x1ba   : > { %2329 = vpow2.f32 %v740_v2  ;;  %v1092_v2 = vunpack.c.l.bf16 %v873_v63 }
 0x1c4   : > { %v2324_v3 = vpop.eup %2323 }
 0x1c5   : > { %v2326_v8 = vpop.eup %2325  ;;  %v742_v9 = vadd.f32 1.0, %v2324_v3  ;;  %v745_v15 = vmul.f32 -0.5, %v2324_v3  ;;  %v748_v22 = vand.u32 2147483647, %v2324_v3 }
 0x1c6   : > { %v2328_v10 = vpop.eup %2327  ;;  %v760_v13 = vadd.f32 1.0, %v2326_v8  ;;  %v763_v18 = vmul.f32 -0.5, %v2326_v8  ;;  %v766_v37 = vand.u32 2147483647, %v2326_v8 }
 0x1c7   : > { %v2330_v11 = vpop.eup %2329  ;;  %v751_v12 = vadd.f32 1.0, %v2328_v10  ;;  %2331 = vlog2.f32 %v742_v9  ;;  %v754_v16 = vmul.f32 -0.5, %v2328_v10  ;;  %v746_v19 = vadd.f32 1.0, %v745_v15 }
 0x1c8   : > { %v769_v14 = vadd.f32 1.0, %v2330_v11  ;;  %v772_v17 = vmul.f32 -0.5, %v2330_v11  ;;  %v757_v25 = vand.u32 2147483647, %v2328_v10  ;;  %v775_v31 = vand.u32 2147483647, %v2330_v11 }
 0x1c9   : > { %2333 = vlog2.f32 %v751_v12  ;;  %v755_v21 = vadd.f32 1.0, %v754_v16  ;;  %v764_v33 = vadd.f32 1.0, %v763_v18  ;;  %v747_v36 = vmul.f32 %v2324_v3, %v746_v19  ;;  %v869_v3 = vld [vmem:[#allocation8 + $0x2b8] sm:$0xff] }
 0x1ca   : > { %2335 = vlog2.f32 %v769_v14  ;;  %v773_v28 = vadd.f32 1.0, %v772_v17  ;;  %vm2959_vm3 = vcmp.lt.f32.partialorder %v748_v22, 0.0004427343  ;;  %vm758_vm4 = vcmp.lt.f32.partialorder %v757_v25, 0.0004427343  ;;  %v801_v16 = vld [vmem:[#allocation8 + $0x98] sm:$0xff] }
 0x1cb   : > { %2337 = vlog2.f32 %v760_v13  ;;  %v756_v43 = vmul.f32 %v2328_v10, %v755_v21  ;;  %vm776_vm5 = vcmp.lt.f32.partialorder %v775_v31, 0.0004427343  ;;  %v765_v52 = vmul.f32 %v2326_v8, %v764_v33  ;;  %v803_v10 = vld [vmem:[#allocation8 + $0xa8] sm:$0xff]  ;;  %v865_v19 = vld [vmem:[#allocation8 + $0x298] sm:$0xff] }
 0x1cc   : > { %v774_v48 = vmul.f32 %v2330_v11, %v773_v28  ;;  %vm767_vm7 = vcmp.lt.f32.partialorder %v766_v37, 0.0004427343  ;;  %v960_v8 = vunpack.c.l.bf16 %v807_v4  ;;  %v1089_v9 = vunpack.c.h.bf16 %v871_v61  ;;  %v867_v13 = vld [vmem:[#allocation8 + $0x2a8] sm:$0xff]  ;;  %v861_v33 = vld [vmem:[#allocation8 + $0x278] sm:$0xff] }
 0x1cd   : > { %v1088_v11 = vunpack.c.l.bf16 %v871_v61  ;;  %v957_v12 = vunpack.c.h.bf16 %v805_v7  ;;  %v956_v14 = vunpack.c.l.bf16 %v805_v7  ;;  %v1085_v15 = vunpack.c.h.bf16 %v869_v3  ;;  %v799_v22 = vld [vmem:[#allocation8 + $0x88] sm:$0xff] }
 0x1ce   : > { %v1084_v17 = vunpack.c.l.bf16 %v869_v3  ;;  %v953_v18 = vunpack.c.h.bf16 %v803_v10  ;;  %v952_v20 = vunpack.c.l.bf16 %v803_v10  ;;  %v1081_v21 = vunpack.c.h.bf16 %v867_v13  ;;  %v863_v25 = vld [vmem:[#allocation8 + $0x288] sm:$0xff]  ;;  %v785_v3 = vld [vmem:[#allocation8 + $0x18] sm:$0xff] }
 0x1cf   : > { %v948_v28 = vunpack.c.l.bf16 %v801_v16  ;;  %v1076_v31 = vunpack.c.l.bf16 %v865_v19  ;;  %v1072_v37 = vunpack.c.l.bf16 %v863_v25  ;;  %v787_v61 = vld [vmem:[#allocation8 + $0x28] sm:$0xff]  ;;  %v849_v10 = vld [vmem:[#allocation8 + $0x218] sm:$0xff] }
 0x1d0   : > { %v851_v7 = vld [vmem:[#allocation8 + $0x228] sm:$0xff] }
 0x1d4   : > { %v2332_v24 = vpop.eup %2331 }
 0x1d5   : > { %v744_v32 = vmul.f32 0.6931472, %v2332_v24  ;;  %v949_v24 = vunpack.c.h.bf16 %v801_v16  ;;  %v847_v16 = vld [vmem:[#allocation8 + $0x208] sm:$0xff] }
 0x1d6   : > { %v2334_v35 = vpop.eup %2333 }
 0x1d7   : > { %v2336_v39 = vpop.eup %2335  ;;  %v753_v40 = vmul.f32 0.6931472, %v2334_v35  ;;  %v750_v49 = vsel %vm2959_vm3, %v747_v36, %v744_v32  ;;  %v945_v32 = vunpack.c.h.bf16 %v799_v22  ;;  %v1073_v35 = vunpack.c.h.bf16 %v863_v25  ;;  %v795_v36 = vld [vmem:[#allocation8 + $0x68] sm:$0xff] }
 0x1d8   : > { %v2338_v27 = vpop.eup %2337  ;;  %v771_v47 = vmul.f32 0.6931472, %v2336_v39  ;;  %v2971_v58 = vsel %vm726_vm1, %v2937_v57, %v750_v49  ;;  %v965_v57 = vunpack.c.h.bf16 %v809_v55  ;;  %v859_v39 = vld [vmem:[#allocation8 + $0x268] sm:$0xff]  ;;  %v936_v49 = vunpack.c.l.bf16 %v795_v36 }
 0x1d9   : > { %v759_v50 = vsel %vm758_vm4, %v756_v43, %v753_v40  ;;  %v762_v51 = vmul.f32 0.6931472, %v2338_v27  ;;  %v1069_v43 = vunpack.c.h.bf16 %v861_v33  ;;  %v1068_v27 = vunpack.c.l.bf16 %v861_v33  ;;  %v843_v25 = vld [vmem:[#allocation8 + $0x1e8] sm:$0xff]  ;;  %v841_v33 = vld [vmem:[#allocation8 + $0x1d8] sm:$0xff] }
 0x1da   : > { %v779_v53 = vsel %vm727_vm2, %v2942_v0, %v759_v50  ;;  %v777_v54 = vsel %vm776_vm5, %v774_v48, %v771_v47  ;;  %v937_v47 = vunpack.c.h.bf16 %v795_v36  ;;  %v857_v48 = vld [vmem:[#allocation8 + $0x258] sm:$0xff]  ;;  %v1065_v50 = vunpack.c.h.bf16 %v859_v39 }
 0x1db   : > { %1230 = vmatprep.mubr.f32.mxu0 %v779_v53  ;;  %v781_v56 = vsel %vm729_vm6, %v2945_v1, %v777_v54  ;;  %v768_v62 = vsel %vm767_vm7, %v765_v52, %v762_v51  ;;  %v1096_v1 = vunpack.c.l.bf16 %v2951_v23  ;;  %v1080_v23 = vunpack.c.l.bf16 %v867_v13  ;;  %v791_v51 = vld [vmem:[#allocation8 + $0x48] sm:$0xff]  ;;  %v905_v36 = vld [vmem:[#allocation8 + $0x3d8] sm:$0xff] }
 0x1dc   : > { %1301 = vmatprep.mubr.f32.mxu1 %v781_v56  ;;  %1231 = vmatmul.mubr.f32.vlgmr.msra.gmra.mxu0 %v2971_v58  ;;  %v2976_v0 = vsel %vm728_vm8, %v2939_v59, %v768_v62  ;;  %v961_v59 = vunpack.c.h.bf16 %v807_v4  ;;  %v1064_v52 = vunpack.c.l.bf16 %v859_v39  ;;  %v855_v54 = vld [vmem:[#allocation8 + $0x248] sm:$0xff]  ;;  %v932_v55 = vunpack.c.l.bf16 %v793_v26  ;;  %v789_v62 = vld [vmem:[#allocation8 + $0x38] sm:$0xff] }
 0x1dd   : > { %1302 = vmatmul.mubr.f32.vlgmr.msra.gmra.mxu1 %v2976_v0  ;;  %1309 = vmatpush1.msra.mxu0 %v972_v29  ;;  %v1077_v29 = vunpack.c.h.bf16 %v865_v19  ;;  %v1060_v63 = vunpack.c.l.bf16 %v857_v48  ;;  %v853_v4 = vld [vmem:[#allocation8 + $0x238] sm:$0xff]  ;;  %v783_v13 = vld [vmem:[#allocation8 + $0x8] sm:$0xff] }
 0x1de   : > { %1380 = vmatpush1.msra.mxu1 %v1100_v30  ;;  %1310 = vmatprep.subr.mxu0 %v969_v34  ;;  %v797_v30 = vld [vmem:[#allocation8 + $0x78] sm:$0xff]  ;;  %v944_v34 = vunpack.c.l.bf16 %v799_v22  ;;  %v839_v39 = vld [vmem:[#allocation8 + $0x1c8] sm:$0xff] }
 0x1df   : > { %1372 = vmatprep.mubr.f32.mxu0 %v779_v53  ;;  %1381 = vmatprep.subr.mxu1 %v1097_v38  ;;  %v941_v38 = vunpack.c.h.bf16 %v797_v30  ;;  %v940_v40 = vunpack.c.l.bf16 %v797_v30  ;;  %v933_v53 = vunpack.c.h.bf16 %v793_v26  ;;  %v845_v19 = vld [vmem:[#allocation8 + $0x1f8] sm:$0xff]  ;;  %v907_v30 = vld [vmem:[#allocation8 + $0x3e8] sm:$0xff] }
 0x1e0   : > { %1443 = vmatprep.mubr.f32.mxu1 %v781_v56  ;;  %1311 = vmatpush1.msra.mxu0 %v968_v60  ;;  %v1061_v56 = vunpack.c.h.bf16 %v857_v48  ;;  %v929_v60 = vunpack.c.h.bf16 %v791_v51  ;;  %v909_v22 = vld [vmem:[#allocation8 + $0x3f8] sm:$0xff]  ;;  %v903_v26 = vld [vmem:[#allocation8 + $0x3c8] sm:$0xff] }
 0x1e1   : > { %1382 = vmatpush1.msra.mxu1 %v1096_v1  ;;  %1312 = vmatprep.subr.mxu0 %v965_v57  ;;  %v928_v1 = vunpack.c.l.bf16 %v791_v51  ;;  %v1057_v57 = vunpack.c.h.bf16 %v855_v54  ;;  %v837_v48 = vld [vmem:[#allocation8 + $0x1b8] sm:$0xff] }
 0x1e2   : > { %1383 = vmatprep.subr.mxu1 %v1093_v6  ;;  %1313 = vmatpush1.msra.mxu0 %v964_v5  ;;  %v1056_v5 = vunpack.c.l.bf16 %v855_v54  ;;  %v925_v6 = vunpack.c.h.bf16 %v789_v62  ;;  %v901_v51 = vld [vmem:[#allocation8 + $0x3b8] sm:$0xff]  ;;  %v835_v54 = vld [vmem:[#allocation8 + $0x1a8] sm:$0xff] }
 0x1e3   : > { %1384 = vmatpush1.msra.mxu1 %v1092_v2  ;;  %1314 = vmatprep.subr.mxu0 %v961_v59  ;;  %v924_v2 = vunpack.c.l.bf16 %v789_v62  ;;  %v1053_v59 = vunpack.c.h.bf16 %v853_v4  ;;  %v899_v62 = vld [vmem:[#allocation8 + $0x3a8] sm:$0xff] }
 0x1e4   : > { %1385 = vmatprep.subr.mxu1 %v1089_v9  ;;  %1315 = vmatpush1.msra.mxu0 %v960_v8  ;;  %v1052_v8 = vunpack.c.l.bf16 %v853_v4  ;;  %v921_v9 = vunpack.c.h.bf16 %v787_v61  ;;  %v833_v4 = vld [vmem:[#allocation8 + $0x198] sm:$0xff] }
 0x1e5   : > { %1386 = vmatpush1.msra.mxu1 %v1088_v11  ;;  %1316 = vmatprep.subr.mxu0 %v957_v12  ;;  %v920_v11 = vunpack.c.l.bf16 %v787_v61  ;;  %v1049_v12 = vunpack.c.h.bf16 %v851_v7  ;;  %v897_v61 = vld [vmem:[#allocation8 + $0x398] sm:$0xff] }
 0x1e6   : > { %1387 = vmatprep.subr.mxu1 %v1085_v15  ;;  %1317 = vmatpush1.msra.mxu0 %v956_v14  ;;  %v1048_v14 = vunpack.c.l.bf16 %v851_v7  ;;  %v917_v15 = vunpack.c.h.bf16 %v785_v3  ;;  %v831_v7 = vld [vmem:[#allocation8 + $0x188] sm:$0xff] }
 0x1e7   : > { %1388 = vmatpush1.msra.mxu1 %v1084_v17  ;;  %1318 = vmatprep.subr.mxu0 %v953_v18  ;;  %v916_v17 = vunpack.c.l.bf16 %v785_v3  ;;  %v1045_v18 = vunpack.c.h.bf16 %v849_v10  ;;  %v895_v3 = vld [vmem:[#allocation8 + $0x388] sm:$0xff] }
 0x1e8   : > { %1389 = vmatprep.subr.mxu1 %v1081_v21  ;;  %1319 = vmatpush1.msra.mxu0 %v952_v20  ;;  %v1044_v20 = vunpack.c.l.bf16 %v849_v10  ;;  %v913_v21 = vunpack.c.h.bf16 %v783_v13  ;;  %v829_v10 = vld [vmem:[#allocation8 + $0x178] sm:$0xff] }
 0x1e9   : > { %1390 = vmatpush1.msra.mxu1 %v1080_v23  ;;  %1320 = vmatprep.subr.mxu0 %v949_v24  ;;  %v912_v23 = vunpack.c.l.bf16 %v783_v13  ;;  %v1041_v24 = vunpack.c.h.bf16 %v847_v16  ;;  %v893_v13 = vld [vmem:[#allocation8 + $0x378] sm:$0xff] }
 0x1ea   : > { %1391 = vmatprep.subr.mxu1 %v1077_v29  ;;  %1321 = vmatpush1.msra.mxu0 %v948_v28  ;;  %v1040_v28 = vunpack.c.l.bf16 %v847_v16  ;;  %v1037_v29 = vunpack.c.h.bf16 %v845_v19  ;;  %v827_v16 = vld [vmem:[#allocation8 + $0x168] sm:$0xff] }
 0x1eb   : > { %1392 = vmatpush1.msra.mxu1 %v1076_v31  ;;  %1322 = vmatprep.subr.mxu0 %v945_v32  ;;  %v1036_v31 = vunpack.c.l.bf16 %v845_v19  ;;  %v1165_v32 = vunpack.c.h.bf16 %v909_v22  ;;  %v891_v19 = vld [vmem:[#allocation8 + $0x368] sm:$0xff] }
 0x1ec   : > { %1393 = vmatprep.subr.mxu1 %v1073_v35  ;;  %1323 = vmatpush1.msra.mxu0 %v944_v34  ;;  %v1164_v34 = vunpack.c.l.bf16 %v909_v22  ;;  %v1033_v35 = vunpack.c.h.bf16 %v843_v25  ;;  %v825_v22 = vld [vmem:[#allocation8 + $0x158] sm:$0xff] }
 0x1ed   : > { %1394 = vmatpush1.msra.mxu1 %v1072_v37  ;;  %1324 = vmatprep.subr.mxu0 %v941_v38  ;;  %v1032_v37 = vunpack.c.l.bf16 %v843_v25  ;;  %v1161_v38 = vunpack.c.h.bf16 %v907_v30  ;;  %v889_v25 = vld [vmem:[#allocation8 + $0x358] sm:$0xff] }
 0x1ee   : > { %1395 = vmatprep.subr.mxu1 %v1069_v43  ;;  %1325 = vmatpush1.msra.mxu0 %v940_v40  ;;  %v1160_v40 = vunpack.c.l.bf16 %v907_v30  ;;  %v1029_v43 = vunpack.c.h.bf16 %v841_v33  ;;  %v823_v30 = vld [vmem:[#allocation8 + $0x148] sm:$0xff] }
 0x1ef   : > { %1396 = vmatpush1.msra.mxu1 %v1068_v27  ;;  %1326 = vmatprep.subr.mxu0 %v937_v47  ;;  %v1028_v27 = vunpack.c.l.bf16 %v841_v33  ;;  %v1157_v47 = vunpack.c.h.bf16 %v905_v36  ;;  %v887_v33 = vld [vmem:[#allocation8 + $0x348] sm:$0xff] }
 0x1f0   : > { %1397 = vmatprep.subr.mxu1 %v1065_v50  ;;  %1327 = vmatpush1.msra.mxu0 %v936_v49  ;;  %v1156_v49 = vunpack.c.l.bf16 %v905_v36  ;;  %v1025_v50 = vunpack.c.h.bf16 %v839_v39  ;;  %v821_v36 = vld [vmem:[#allocation8 + $0x138] sm:$0xff] }
 0x1f1   : > { %1398 = vmatpush1.msra.mxu1 %v1064_v52  ;;  %1328 = vmatprep.subr.mxu0 %v933_v53  ;;  %v1024_v52 = vunpack.c.l.bf16 %v839_v39  ;;  %v1153_v53 = vunpack.c.h.bf16 %v903_v26  ;;  %v885_v39 = vld [vmem:[#allocation8 + $0x338] sm:$0xff] }
 0x1f2   : > { %1399 = vmatprep.subr.mxu1 %v1061_v56  ;;  %1329 = vmatpush1.msra.mxu0 %v932_v55  ;;  %v1152_v55 = vunpack.c.l.bf16 %v903_v26  ;;  %v1021_v56 = vunpack.c.h.bf16 %v837_v48  ;;  %v819_v26 = vld [vmem:[#allocation8 + $0x128] sm:$0xff] }
 0x1f3   : > { %1400 = vmatpush1.msra.mxu1 %v1060_v63  ;;  %1330 = vmatprep.subr.mxu0 %v929_v60  ;;  %v1020_v63 = vunpack.c.l.bf16 %v837_v48  ;;  %v1149_v60 = vunpack.c.h.bf16 %v901_v51  ;;  %v883_v48 = vld [vmem:[#allocation8 + $0x328] sm:$0xff] }
 0x1f4   : > { %1401 = vmatprep.subr.mxu1 %v1057_v57  ;;  %1331 = vmatpush1.msra.mxu0 %v928_v1  ;;  %v1148_v1 = vunpack.c.l.bf16 %v901_v51  ;;  %v1017_v57 = vunpack.c.h.bf16 %v835_v54  ;;  %v817_v51 = vld [vmem:[#allocation8 + $0x118] sm:$0xff] }
 0x1f5   : > { %1402 = vmatpush1.msra.mxu1 %v1056_v5  ;;  %1332 = vmatprep.subr.mxu0 %v925_v6  ;;  %v1016_v5 = vunpack.c.l.bf16 %v835_v54  ;;  %v1145_v6 = vunpack.c.h.bf16 %v899_v62  ;;  %v881_v54 = vld [vmem:[#allocation8 + $0x318] sm:$0xff] }
 0x1f6   : > { %1403 = vmatprep.subr.mxu1 %v1053_v59  ;;  %1333 = vmatpush1.msra.mxu0 %v924_v2  ;;  %v1144_v2 = vunpack.c.l.bf16 %v899_v62  ;;  %v1013_v59 = vunpack.c.h.bf16 %v833_v4  ;;  %v815_v62 = vld [vmem:[#allocation8 + $0x108] sm:$0xff] }
 0x1f7   : > { %1404 = vmatpush1.msra.mxu1 %v1052_v8  ;;  %1334 = vmatprep.subr.mxu0 %v921_v9  ;;  %v1012_v8 = vunpack.c.l.bf16 %v833_v4  ;;  %v1141_v9 = vunpack.c.h.bf16 %v897_v61  ;;  %v879_v4 = vld [vmem:[#allocation8 + $0x308] sm:$0xff] }
 0x1f8   : > { %1405 = vmatprep.subr.mxu1 %v1049_v12  ;;  %1335 = vmatpush1.msra.mxu0 %v920_v11  ;;  %v1140_v11 = vunpack.c.l.bf16 %v897_v61  ;;  %v1009_v12 = vunpack.c.h.bf16 %v831_v7  ;;  %v1108_v61 = vunpack.c.l.bf16 %v881_v54 }
 0x1f9   : > { %1406 = vmatpush1.msra.mxu1 %v1048_v14  ;;  %1336 = vmatprep.subr.mxu0 %v917_v15  ;;  %v1008_v14 = vunpack.c.l.bf16 %v831_v7  ;;  %v1137_v15 = vunpack.c.h.bf16 %v895_v3  ;;  %v1105_v7 = vunpack.c.h.bf16 %v879_v4 }
 0x1fa   : > { %1407 = vmatprep.subr.mxu1 %v1045_v18  ;;  %1337 = vmatpush1.msra.mxu0 %v916_v17  ;;  %v1136_v17 = vunpack.c.l.bf16 %v895_v3  ;;  %v1005_v18 = vunpack.c.h.bf16 %v829_v10 }
 0x1fb   : > { %1408 = vmatpush1.msra.mxu1 %v1044_v20  ;;  %1338 = vmatprep.subr.mxu0 %v913_v21  ;;  %v1004_v20 = vunpack.c.l.bf16 %v829_v10  ;;  %v1133_v21 = vunpack.c.h.bf16 %v893_v13 }
 0x1fc   : > { %1409 = vmatprep.subr.mxu1 %v1041_v24  ;;  %1339 = vmatpush1.msra.mxu0 %v912_v23  ;;  %v1132_v23 = vunpack.c.l.bf16 %v893_v13  ;;  %v1001_v24 = vunpack.c.h.bf16 %v827_v16 }
 0x1fd   : > { %1410 = vmatpush1.msra.mxu1 %v1040_v28  ;;  %1340 = vmatprep.subr.mxu0 %v1037_v29  ;;  %v1000_v28 = vunpack.c.l.bf16 %v827_v16  ;;  %v1129_v29 = vunpack.c.h.bf16 %v891_v19 }
 0x1fe   : > { %1411 = vmatprep.subr.mxu1 %v1165_v32  ;;  %1341 = vmatpush2.msra.mxu0 %v1036_v31  ;;  %v1128_v31 = vunpack.c.l.bf16 %v891_v19  ;;  %v997_v32 = vunpack.c.h.bf16 %v825_v22 }
 0x1ff   : > { %1412 = vmatpush2.msra.mxu1 %v1164_v34  ;;  %1342 = vmatprep.subr.mxu0 %v1033_v35  ;;  %v996_v34 = vunpack.c.l.bf16 %v825_v22  ;;  %v1125_v35 = vunpack.c.h.bf16 %v889_v25 }
 0x200   : > { %1413 = vmatprep.subr.mxu1 %v1161_v38  ;;  %1343 = vmatpush2.msra.mxu0 %v1032_v37  ;;  %v1124_v37 = vunpack.c.l.bf16 %v889_v25  ;;  %v993_v38 = vunpack.c.h.bf16 %v823_v30 }
 0x201   : > { %1414 = vmatpush2.msra.mxu1 %v1160_v40  ;;  %1344 = vmatprep.subr.mxu0 %v1029_v43  ;;  %v992_v40 = vunpack.c.l.bf16 %v823_v30  ;;  %v1121_v43 = vunpack.c.h.bf16 %v887_v33 }
 0x202   : > { %1415 = vmatprep.subr.mxu1 %v1157_v47  ;;  %1345 = vmatpush2.msra.mxu0 %v1028_v27  ;;  %v1120_v27 = vunpack.c.l.bf16 %v887_v33  ;;  %v989_v47 = vunpack.c.h.bf16 %v821_v36 }
 0x203   : > { %1416 = vmatpush2.msra.mxu1 %v1156_v49  ;;  %1346 = vmatprep.subr.mxu0 %v1025_v50  ;;  %v988_v49 = vunpack.c.l.bf16 %v821_v36  ;;  %v1117_v50 = vunpack.c.h.bf16 %v885_v39 }
 0x204   : > { %1417 = vmatprep.subr.mxu1 %v1153_v53  ;;  %1347 = vmatpush2.msra.mxu0 %v1024_v52  ;;  %v1116_v52 = vunpack.c.l.bf16 %v885_v39  ;;  %v985_v53 = vunpack.c.h.bf16 %v819_v26 }
 0x205   : > { %1418 = vmatpush2.msra.mxu1 %v1152_v55  ;;  %1348 = vmatprep.subr.mxu0 %v1021_v56  ;;  %v984_v55 = vunpack.c.l.bf16 %v819_v26  ;;  %v1113_v56 = vunpack.c.h.bf16 %v883_v48 }
 0x206   : > { %1419 = vmatprep.subr.mxu1 %v1149_v60  ;;  %1349 = vmatpush2.msra.mxu0 %v1020_v63  ;;  %v1112_v63 = vunpack.c.l.bf16 %v883_v48  ;;  %v981_v60 = vunpack.c.h.bf16 %v817_v51 }
 0x207   : > { %1420 = vmatpush2.msra.mxu1 %v1148_v1  ;;  %1350 = vmatprep.subr.mxu0 %v1017_v57  ;;  %v980_v1 = vunpack.c.l.bf16 %v817_v51  ;;  %v1109_v57 = vunpack.c.h.bf16 %v881_v54 }
 0x208   : > { %1421 = vmatprep.subr.mxu1 %v1145_v6  ;;  %1351 = vmatpush2.msra.mxu0 %v1016_v5  ;;  %v977_v5 = vunpack.c.h.bf16 %v815_v62  ;;  %v976_v6 = vunpack.c.l.bf16 %v815_v62 }
 0x209   : > { %1422 = vmatpush2.msra.mxu1 %v1144_v2  ;;  %1352 = vmatprep.subr.mxu0 %v1013_v59  ;;  %v1104_v2 = vunpack.c.l.bf16 %v879_v4 }
 0x20a   : > { %1423 = vmatprep.subr.mxu1 %v1141_v9  ;;  %1353 = vmatpush2.msra.mxu0 %v1012_v8 }
 0x20b   : > { %1424 = vmatpush2.msra.mxu1 %v1140_v11  ;;  %1354 = vmatprep.subr.mxu0 %v1009_v12 }
 0x20c   : > { %1425 = vmatprep.subr.mxu1 %v1137_v15  ;;  %1355 = vmatpush2.msra.mxu0 %v1008_v14 }
 0x20d   : > { %1426 = vmatpush2.msra.mxu1 %v1136_v17  ;;  %1356 = vmatprep.subr.mxu0 %v1005_v18 }
 0x20e   : > { %1427 = vmatprep.subr.mxu1 %v1133_v21  ;;  %1357 = vmatpush2.msra.mxu0 %v1004_v20 }
 0x20f   : > { %1428 = vmatpush2.msra.mxu1 %v1132_v23  ;;  %1358 = vmatprep.subr.mxu0 %v1001_v24 }
 0x210   : > { %1429 = vmatprep.subr.mxu1 %v1129_v29  ;;  %1359 = vmatpush2.msra.mxu0 %v1000_v28 }
 0x211   : > { %1430 = vmatpush2.msra.mxu1 %v1128_v31  ;;  %1360 = vmatprep.subr.mxu0 %v997_v32 }
 0x212   : > { %1431 = vmatprep.subr.mxu1 %v1125_v35  ;;  %1361 = vmatpush2.msra.mxu0 %v996_v34 }
 0x213   : > { %1432 = vmatpush2.msra.mxu1 %v1124_v37  ;;  %1362 = vmatprep.subr.mxu0 %v993_v38 }
 0x214   : > { %1433 = vmatprep.subr.mxu1 %v1121_v43  ;;  %1363 = vmatpush2.msra.mxu0 %v992_v40 }
 0x215   : > { %1434 = vmatpush2.msra.mxu1 %v1120_v27  ;;  %1364 = vmatprep.subr.mxu0 %v989_v47 }
 0x216   : > { %1435 = vmatprep.subr.mxu1 %v1117_v50  ;;  %1365 = vmatpush2.msra.mxu0 %v988_v49  ;;  %v2983_v49 = vld [vmem:[#allocation11] sm:$0xf] }
 0x217   : > { %1436 = vmatpush2.msra.mxu1 %v1116_v52  ;;  %1366 = vmatprep.subr.mxu0 %v985_v53  ;;  %v1531_v50 = vrot.slane %v2983_v49, %v704_v42  ;;  %v1535_v53 = vrot.slane %v2983_v49, %v708_v45 }
 0x218   : > { %1437 = vmatprep.subr.mxu1 %v1113_v56  ;;  %1367 = vmatpush2.msra.mxu0 %v984_v55 }
 0x219   : > { %1438 = vmatpush2.msra.mxu1 %v1112_v63  ;;  %1368 = vmatprep.subr.mxu0 %v981_v60 }
 0x21a   : > { %1439 = vmatprep.subr.mxu1 %v1109_v57  ;;  %1369 = vmatpush2.msra.mxu0 %v980_v1 }
 0x21b   : > { %1440 = vmatpush2.msra.mxu1 %v1108_v61  ;;  %1370 = vmatprep.subr.mxu0 %v977_v5 }
 0x21c   : > { %1441 = vmatprep.subr.mxu1 %v1105_v7  ;;  %1371 = vmatpush2.msra.mxu0 %v976_v6 }
 0x21d   : > { %1442 = vmatpush2.msra.mxu1 %v1104_v2  ;;  %1373 = vmatmul.mubr.f32.vlgmr.msra.gmra.mxu0 %v2971_v58 }
 0x21e   : > { %1444 = vmatmul.mubr.f32.vlgmr.msra.gmra.mxu1 %v2976_v0 }
 0x29c   : > { %v1232_v59 = vpop.f32.mrf.mxu0 }
 0x29d   : > { %v1303_v3 = vpop.f32.mrf.mxu1 }
 0x29e   : > { %v1304_v8 = vadd.f32 %v1303_v3, %v1232_v59  ;;  %v1234_v9 = vpop.f32.mrf.mxu0 }
 0x29f   : > { %v1305_v10 = vpop.f32.mrf.mxu1 }
 0x2a0   : > { %v1450_v11 = vrot.slane %v1304_v8, 4  ;;  %v1306_v12 = vadd.f32 %v1305_v10, %v1234_v9 }
 0x2a2   : > { %v1451_v13 = vadd.f32 %v1450_v11, %v1304_v8  ;;  %v1456_v14 = vrot.slane %v1306_v12, 4 }
 0x2a4   : > { %v1452_v15 = vrot.slane %v1451_v13, 2  ;;  %v1457_v16 = vadd.f32 %v1456_v14, %v1306_v12 }
 0x2a6   : > { %v1453_v17 = vadd.f32 %v1452_v15, %v1451_v13  ;;  %v1458_v18 = vrot.slane %v1457_v16, 2 }
 0x2a8   : > { %v1454_v19 = vrot.slane %v1453_v17, 1  ;;  %v1459_v20 = vadd.f32 %v1458_v18, %v1457_v16 }
 0x2aa   : > { %v1455_v21 = vadd.f32 %v1454_v19, %v1453_v17  ;;  %v1460_v22 = vrot.slane %v1459_v20, 1 }
 0x2ac   : > { %v1474_v58 = vmul.f32 0.125, %v1455_v21  ;;  %v1461_v23 = vadd.f32 %v1460_v22, %v1459_v20 }
 0x2ae   : > { %v1478_v0 = vsub.f32 %v1304_v8, %v1474_v58  ;;  %v1475_v24 = vmul.f32 0.125, %v1461_v23 }
 0x2b0   : > { %v1482_v25 = vmul.f32 %v1478_v0, %v1478_v0  ;;  %v1479_v28 = vsub.f32 %v1306_v12, %v1475_v24 }
 0x2b2   : > { %v1486_v29 = vrot.slane %v1482_v25, 4  ;;  %v1483_v30 = vmul.f32 %v1479_v28, %v1479_v28 }
 0x2b4   : > { %v1487_v31 = vadd.f32 %v1486_v29, %v1482_v25  ;;  %v1492_v32 = vrot.slane %v1483_v30, 4 }
 0x2b6   : > { %v1488_v33 = vrot.slane %v1487_v31, 2  ;;  %v1493_v34 = vadd.f32 %v1492_v32, %v1483_v30 }
 0x2b8   : > { %v1489_v35 = vadd.f32 %v1488_v33, %v1487_v31  ;;  %v1494_v36 = vrot.slane %v1493_v34, 2 }
 0x2ba   : > { %v1490_v37 = vrot.slane %v1489_v35, 1  ;;  %v1495_v38 = vadd.f32 %v1494_v36, %v1493_v34 }
 0x2bc   : > { %v1491_v39 = vadd.f32 %v1490_v37, %v1489_v35  ;;  %v1496_v40 = vrot.slane %v1495_v38, 1 }
 0x2be   : > { %v1510_v43 = vmul.f32 0.125, %v1491_v39  ;;  %v1497_v26 = vadd.f32 %v1496_v40, %v1495_v38 }
 0x2c0   : > { %v1514_v27 = vadd.f32 1e-06, %v1510_v43  ;;  %v1511_v47 = vmul.f32 0.125, %v1497_v26 }
 0x2c2   : > { %2339 = vrsqrt.f32 %v1514_v27  ;;  %v1515_v48 = vadd.f32 1e-06, %v1511_v47 }
 0x2c4   : > { %2341 = vrsqrt.f32 %v1515_v48 }
 0x2cf   : > { %v2340_v51 = vpop.eup %2339 }
 0x2d0   : > { %v1522_v52 = vmul.f32 %v2340_v51, %v1478_v0 }
 0x2d1   : > { %v2342_v54 = vpop.eup %2341 }
 0x2d2   : > { %v1548_v55 = vadd.f32 %v1531_v50, %v1522_v52  ;;  %v1523_v56 = vmul.f32 %v2342_v54, %v1479_v28 }
 0x2d4   : > { %v1556_v62 = vmin.f32 %v1548_v55, 20.0  ;;  %v2991_v63 = vadd.f32 %v1535_v53, %v1523_v56  ;;  %vm1552_vm10 = vcmp.gt.f32.partialorder %v1548_v55, 20.0 }
 0x2d6   : > { %v1560_v60 = vmul.f32 1.442695, %v1556_v62  ;;  %v1557_v4 = vmin.f32 %v2991_v63, 20.0  ;;  %vm1553_vm12 = vcmp.gt.f32.partialorder %v2991_v63, 20.0 }
 0x2d8   : > { %2343 = vpow2.f32 %v1560_v60  ;;  %v1562_v1 = vmul.f32 1.442695, %v1557_v4 }
 0x2da   : > { %2345 = vpow2.f32 %v1562_v1 }
 0x2dd   : > { %v1374_v57 = vpop.f32.mrf.mxu0 }
 0x2de   : > { %v1445_v42 = vpop.f32.mrf.mxu1 }
 0x2df   : > { %v1446_v61 = vadd.f32 %v1445_v42, %v1374_v57  ;;  %v1376_v5 = vpop.f32.mrf.mxu0  ;;  %v1539_v42 = vrot.slane %v2983_v49, %v712_v44 }
 0x2e0   : > { %v1447_v6 = vpop.f32.mrf.mxu1 }
 0x2e1   : > { %v1462_v7 = vrot.slane %v1446_v61, 4  ;;  %v1448_v2 = vadd.f32 %v1447_v6, %v1376_v5 }
 0x2e3   : > { %v1463_v45 = vadd.f32 %v1462_v7, %v1446_v61  ;;  %v1468_v59 = vrot.slane %v1448_v2, 4 }
 0x2e5   : > { %v2344_v3 = vpop.eup %2343  ;;  %v1464_v8 = vrot.slane %v1463_v45, 2  ;;  %v1469_v9 = vadd.f32 %v1468_v59, %v1448_v2 }
 0x2e6   : > { %v1568_v10 = vadd.f32 1.0, %v2344_v3  ;;  %v1571_v21 = vmul.f32 -0.5, %v2344_v3  ;;  %v1574_v28 = vand.u32 2147483647, %v2344_v3 }
 0x2e7   : > { %v2346_v11 = vpop.eup %2345  ;;  %v1465_v12 = vadd.f32 %v1464_v8, %v1463_v45  ;;  %v1470_v13 = vrot.slane %v1469_v9, 2 }
 0x2e8   : > { %2347 = vlog2.f32 %v1568_v10  ;;  %v1577_v14 = vadd.f32 1.0, %v2346_v11  ;;  %v1580_v23 = vmul.f32 -0.5, %v2346_v11  ;;  %v1572_v25 = vadd.f32 1.0, %v1571_v21 }
 0x2e9   : > { %v1466_v15 = vrot.slane %v1465_v12, 1  ;;  %v1471_v16 = vadd.f32 %v1470_v13, %v1469_v9  ;;  %v1583_v33 = vand.u32 2147483647, %v2346_v11  ;;  %vm1575_vm9 = vcmp.lt.f32.partialorder %v1574_v28, 0.0004427343 }
 0x2ea   : > { %2349 = vlog2.f32 %v1577_v14  ;;  %v1581_v31 = vadd.f32 1.0, %v1580_v23  ;;  %v1573_v37 = vmul.f32 %v2344_v3, %v1572_v25 }
 0x2eb   : > { %v1467_v17 = vadd.f32 %v1466_v15, %v1465_v12  ;;  %v1472_v18 = vrot.slane %v1471_v16, 1  ;;  %vm1584_vm11 = vcmp.lt.f32.partialorder %v1583_v33, 0.0004427343 }
 0x2ec   : > { %v1582_v27 = vmul.f32 %v2346_v11, %v1581_v31 }
 0x2ed   : > { %v1476_v19 = vmul.f32 0.125, %v1467_v17  ;;  %v1473_v20 = vadd.f32 %v1472_v18, %v1471_v16 }
 0x2ef   : > { %v1480_v22 = vsub.f32 %v1446_v61, %v1476_v19  ;;  %v1477_v58 = vmul.f32 0.125, %v1473_v20 }
 0x2f1   : > { %v1484_v0 = vmul.f32 %v1480_v22, %v1480_v22  ;;  %v1481_v24 = vsub.f32 %v1448_v2, %v1477_v58 }
 0x2f3   : > { %v1498_v29 = vrot.slane %v1484_v0, 4  ;;  %v1485_v30 = vmul.f32 %v1481_v24, %v1481_v24 }
 0x2f5   : > { %v2348_v32 = vpop.eup %2347  ;;  %v1499_v34 = vadd.f32 %v1498_v29, %v1484_v0  ;;  %v1504_v35 = vrot.slane %v1485_v30, 4 }
 0x2f6   : > { %v1570_v36 = vmul.f32 0.6931472, %v2348_v32 }
 0x2f7   : > { %v2350_v38 = vpop.eup %2349  ;;  %v1500_v39 = vrot.slane %v1499_v34, 2  ;;  %v1505_v40 = vadd.f32 %v1504_v35, %v1485_v30 }
 0x2f8   : > { %v1576_v43 = vsel %vm1575_vm9, %v1573_v37, %v1570_v36  ;;  %v1579_v26 = vmul.f32 0.6931472, %v2350_v38 }
 0x2f9   : > { %v1604_v47 = vsel %vm1552_vm10, %v1548_v55, %v1576_v43  ;;  %v1501_v48 = vadd.f32 %v1500_v39, %v1499_v34  ;;  %v1506_v50 = vrot.slane %v1505_v40, 2 }
 0x2fa   : > { %1608 = vst [vmem:[#allocation2 + $0x10] sm:$0xff] %v1604_v47  ;;  %v1585_v51 = vsel %vm1584_vm11, %v1582_v27, %v1579_v26 }
 0x2fb   : > { %v1605_v52 = vsel %vm1553_vm12, %v2991_v63, %v1585_v51  ;;  %v1502_v53 = vrot.slane %v1501_v48, 1  ;;  %v1507_v54 = vadd.f32 %v1506_v50, %v1505_v40  ;;  %v1543_v63 = vrot.slane %v2983_v49, %v716_v46 }
 0x2fc   : > { %1609 = vst [vmem:[#allocation2] sm:$0xff] %v1605_v52 }
 0x2fd   : > { %v1503_v56 = vadd.f32 %v1502_v53, %v1501_v48  ;;  %v1508_v62 = vrot.slane %v1507_v54, 1 }
 0x2ff   : > { %v1512_v60 = vmul.f32 0.125, %v1503_v56  ;;  %v1509_v4 = vadd.f32 %v1508_v62, %v1507_v54 }
 0x301   : > { %v1516_v1 = vadd.f32 1e-06, %v1512_v60  ;;  %v1513_v57 = vmul.f32 0.125, %v1509_v4 }
 0x303   : > { %2351 = vrsqrt.f32 %v1516_v1  ;;  %v1517_v55 = vadd.f32 1e-06, %v1513_v57 }
 0x305   : > { %2353 = vrsqrt.f32 %v1517_v55 }
 0x310   : > { %v2352_v61 = vpop.eup %2351 }
 0x311   : > { %v1524_v5 = vmul.f32 %v2352_v61, %v1480_v22 }
 0x312   : > { %v2354_v6 = vpop.eup %2353 }
 0x313   : > { %v1550_v7 = vadd.f32 %v1539_v42, %v1524_v5  ;;  %v1525_v2 = vmul.f32 %v2354_v6, %v1481_v24 }
 0x315   : > { %v1558_v45 = vmin.f32 %v1550_v7, 20.0  ;;  %v1551_v59 = vadd.f32 %v1543_v63, %v1525_v2  ;;  %vm1554_vm14 = vcmp.gt.f32.partialorder %v1550_v7, 20.0 }
 0x317   : > { %v1564_v3 = vmul.f32 1.442695, %v1558_v45  ;;  %v1559_v8 = vmin.f32 %v1551_v59, 20.0  ;;  %vm1555_vm0 = vcmp.gt.f32.partialorder %v1551_v59, 20.0 }
 0x319   : > { %2355 = vpow2.f32 %v1564_v3  ;;  %v1566_v9 = vmul.f32 1.442695, %v1559_v8 }
 0x31b   : > { %2357 = vpow2.f32 %v1566_v9 }
 0x326   : > { %v2356_v10 = vpop.eup %2355 }
 0x327   : > { %v1586_v11 = vadd.f32 1.0, %v2356_v10  ;;  %v1589_v13 = vmul.f32 -0.5, %v2356_v10  ;;  %v1592_v46 = vand.u32 2147483647, %v2356_v10 }
 0x328   : > { %v2358_v12 = vpop.eup %2357 }
 0x329   : > { %2359 = vlog2.f32 %v1586_v11  ;;  %v1595_v44 = vadd.f32 1.0, %v2358_v12  ;;  %v1598_v41 = vmul.f32 -0.5, %v2358_v12  ;;  %v1590_v14 = vadd.f32 1.0, %v1589_v13 }
 0x32a   : > { %v1601_v16 = vand.u32 2147483647, %v2358_v12  ;;  %vm1593_vm13 = vcmp.lt.f32.partialorder %v1592_v46, 0.0004427343 }
 0x32b   : > { %2361 = vlog2.f32 %v1595_v44  ;;  %v1599_v49 = vadd.f32 1.0, %v1598_v41  ;;  %v1591_v18 = vmul.f32 %v2356_v10, %v1590_v14 }
 0x32c   : > { %vm1602_vm15 = vcmp.lt.f32.partialorder %v1601_v16, 0.0004427343 }
 0x32d   : > { %v1600_v22 = vmul.f32 %v2358_v12, %v1599_v49 }
 0x336   : > { %v2360_v15 = vpop.eup %2359 }
 0x337   : > { %v1588_v17 = vmul.f32 0.6931472, %v2360_v15 }
 0x338   : > { %v2362_v19 = vpop.eup %2361 }
 0x339   : > { %v1594_v20 = vsel %vm1593_vm13, %v1591_v18, %v1588_v17  ;;  %v1597_v21 = vmul.f32 0.6931472, %v2362_v19 }
 0x33a   : > { %v1606_v58 = vsel %vm1554_vm14, %v1550_v7, %v1594_v20 }
 0x33b   : > { %1610 = vst [vmem:[#allocation2 + $0x18] sm:$0xff] %v1606_v58  ;;  %v1603_v23 = vsel %vm1602_vm15, %v1600_v22, %v1597_v21 }
 0x33c   : > { %v1607_v0 = vsel %vm1555_vm0, %v1551_v59, %v1603_v23 }
 0x33d   : > { %1611 = vst [vmem:[#allocation2 + $0x8] sm:$0xff] %v1607_v0 }
 0x33e PF: > { %v1631_v24 = vld [vmem:[%s2896_s26 + $0x78] sm:$0xff]  ;;  %v1630_v28 = vld [vmem:[%s2896_s26 + $0x70] sm:$0xff]  ;;  %v1629_v34 = vld [vmem:[%s2896_s26 + $0x68] sm:$0xff]  ;;  %s2206_s1 = sshll.u32 %s2715_s9, 8  ;;  %s2023_s14 = sshll.u32 %s2913_s17, 4  ;;  %s2024_s14 = int_to_ptr.vmem [resolvable:$true] %s2023_s14 }
 0x33f   : > { %v1663_v25 = vld [vmem:[%s2896_s26 + $0x178] sm:$0xff]  ;;  %v1711_v29 = vunpack.c.h.bf16 %v1631_v24  ;;  %v1710_v31 = vunpack.c.l.bf16 %v1631_v24  ;;  %v1662_v33 = vld [vmem:[%s2896_s26 + $0x170] sm:$0xff]  ;;  %v1661_v35 = vld [vmem:[%s2896_s26 + $0x168] sm:$0xff]  ;;  %v1709_v36 = vunpack.c.h.bf16 %v1630_v28  ;;  %v1708_v38 = vunpack.c.l.bf16 %v1630_v28  ;;  %s3078_s15 = scalar_lea.hbm %s3123_s8, %s2206_s1  ;;  %s2009_s9 = scalar_lea.sflag [#allocation5], %s2893_s13 }
 0x340   : > { %v1775_v30 = vunpack.c.h.bf16 %v1663_v25  ;;  %v1774_v32 = vunpack.c.l.bf16 %v1663_v25  ;;  %v1773_v37 = vunpack.c.h.bf16 %v1662_v33  ;;  %v1772_v39 = vunpack.c.l.bf16 %v1662_v33  ;;  %v1628_v40 = vld [vmem:[%s2896_s26 + $0x60] sm:$0xff]  ;;  %v1627_v50 = vld [vmem:[%s2896_s26 + $0x58] sm:$0xff]  ;;  %v1626_v62 = vld [vmem:[%s2896_s26 + $0x50] sm:$0xff]  ;;  %s2557_s25 = scalar_lea.vmem %s2024_s14, 256  ;;  %p3171_p12 = scmp.ne.s32.totalorder %s3149_s20, 0 }
 0x341   : > { %v1660_v43 = vld [vmem:[%s2896_s26 + $0x160] sm:$0xff]  ;;  %1808 = vmatprep.subr.mxu0 %v1711_v29  ;;  %v1707_v26 = vunpack.c.h.bf16 %v1629_v34  ;;  %v1771_v27 = vunpack.c.h.bf16 %v1661_v35  ;;  %v1706_v47 = vunpack.c.l.bf16 %v1629_v34  ;;  %v1770_v48 = vunpack.c.l.bf16 %v1661_v35  ;;  %v1659_v51 = vld [vmem:[%s2896_s26 + $0x158] sm:$0xff]  ;;  %v1658_v60 = vld [vmem:[%s2896_s26 + $0x150] sm:$0xff]  ;;  %p2558_p5 = scmp.ne.s32.totalorder %s2024_s14, %s2557_s25 }
 0x342   : > { %1879 = vmatprep.subr.mxu1 %v1775_v30  ;;  %1809 = vmatpush1.msra.mxu0 %v1710_v31  ;;  %v1705_v52 = vunpack.c.h.bf16 %v1628_v40  ;;  %v1769_v53 = vunpack.c.h.bf16 %v1660_v43  ;;  %v1704_v54 = vunpack.c.l.bf16 %v1628_v40  ;;  %v1768_v56 = vunpack.c.l.bf16 %v1660_v43  ;;  %v1625_v42 = vld [vmem:[%s2896_s26 + $0x48] sm:$0xff]  ;;  %v1624_v2 = vld [vmem:[%s2896_s26 + $0x40] sm:$0xff]  ;;  %v1623_v10 = vld [vmem:[%s2896_s26 + $0x38] sm:$0xff] }
 0x343   : > { %1880 = vmatpush1.msra.mxu1 %v1774_v32  ;;  %1810 = vmatprep.subr.mxu0 %v1709_v36  ;;  %v1703_v4 = vunpack.c.h.bf16 %v1627_v50  ;;  %v1767_v1 = vunpack.c.h.bf16 %v1659_v51  ;;  %v1702_v57 = vunpack.c.l.bf16 %v1627_v50  ;;  %v1766_v55 = vunpack.c.l.bf16 %v1659_v51  ;;  %v1657_v61 = vld [vmem:[%s2896_s26 + $0x148] sm:$0xff]  ;;  %v1656_v45 = vld [vmem:[%s2896_s26 + $0x140] sm:$0xff]  ;;  %v1655_v11 = vld [vmem:[%s2896_s26 + $0x138] sm:$0xff]  ;;  %p2559_p1 = pnand %p2558_p5, %p3171_p12 }
 0x344   : > { %1881 = vmatprep.subr.mxu1 %v1773_v37  ;;  %1811 = vmatpush1.msra.mxu0 %v1708_v38  ;;  %v1701_v5 = vunpack.c.h.bf16 %v1626_v62  ;;  %v1765_v63 = vunpack.c.h.bf16 %v1658_v60  ;;  %v1700_v6 = vunpack.c.l.bf16 %v1626_v62  ;;  %v1764_v7 = vunpack.c.l.bf16 %v1658_v60  ;;  %v1622_v14 = vld [vmem:[%s2896_s26 + $0x30] sm:$0xff]  ;;  %v1621_v18 = vld [vmem:[%s2896_s26 + $0x28] sm:$0xff]  ;;  %v1620_v23 = vld [vmem:[%s2896_s26 + $0x20] sm:$0xff] }
 0x345   : > { %1882 = vmatpush1.msra.mxu1 %v1772_v39  ;;  %1812 = vmatprep.subr.mxu0 %v1707_v26  ;;  %v1699_v59 = vunpack.c.h.bf16 %v1625_v42  ;;  %v1763_v3 = vunpack.c.h.bf16 %v1657_v61  ;;  %v1698_v8 = vunpack.c.l.bf16 %v1625_v42  ;;  %v1762_v9 = vunpack.c.l.bf16 %v1657_v61  ;;  %v1654_v46 = vld [vmem:[%s2896_s26 + $0x130] sm:$0xff]  ;;  %v1653_v19 = vld [vmem:[%s2896_s26 + $0x128] sm:$0xff]  ;;  %v1652_v0 = vld [vmem:[%s2896_s26 + $0x120] sm:$0xff]  ;;  %p2560_p13 = pneg %p2559_p1 }
 0x346   : > { %1883 = vmatprep.subr.mxu1 %v1771_v27  ;;  %1813 = vmatpush1.msra.mxu0 %v1706_v47  ;;  %v1697_v12 = vunpack.c.h.bf16 %v1624_v2  ;;  %v1761_v44 = vunpack.c.h.bf16 %v1656_v45  ;;  %v1696_v13 = vunpack.c.l.bf16 %v1624_v2  ;;  %v1760_v41 = vunpack.c.l.bf16 %v1656_v45  ;;  %v1619_v30 = vld [vmem:[%s2896_s26 + $0x18] sm:$0xff]  ;;  %v1618_v36 = vld [vmem:[%s2896_s26 + $0x10] sm:$0xff]  ;;  %v1617_v26 = vld [vmem:[%s2896_s26 + $0x8] sm:$0xff] }
 0x347   : > { %1884 = vmatpush1.msra.mxu1 %v1770_v48  ;;  %1814 = vmatprep.subr.mxu0 %v1705_v52  ;;  %v1695_v49 = vunpack.c.h.bf16 %v1623_v10  ;;  %v1759_v15 = vunpack.c.h.bf16 %v1655_v11  ;;  %v1694_v16 = vunpack.c.l.bf16 %v1623_v10  ;;  %v1758_v17 = vunpack.c.l.bf16 %v1655_v11  ;;  %v1651_v31 = vld [vmem:[%s2896_s26 + $0x118] sm:$0xff]  ;;  %v1650_v37 = vld [vmem:[%s2896_s26 + $0x110] sm:$0xff]  ;;  %v1649_v27 = vld [vmem:[%s2896_s26 + $0x108] sm:$0xff] }
 0x348   : > { %1885 = vmatprep.subr.mxu1 %v1769_v53  ;;  %1815 = vmatpush1.msra.mxu0 %v1704_v54  ;;  %v1693_v20 = vunpack.c.h.bf16 %v1622_v14  ;;  %v1757_v21 = vunpack.c.h.bf16 %v1654_v46  ;;  %v1692_v22 = vunpack.c.l.bf16 %v1622_v14  ;;  %v1756_v58 = vunpack.c.l.bf16 %v1654_v46  ;;  %v1616_v52 = vld [vmem:[%s2896_s26] sm:$0xff] }
 0x349   : > { %1886 = vmatpush1.msra.mxu1 %v1768_v56  ;;  %1816 = vmatprep.subr.mxu0 %v1703_v4  ;;  %v1691_v24 = vunpack.c.h.bf16 %v1621_v18  ;;  %v1755_v25 = vunpack.c.h.bf16 %v1653_v19  ;;  %v1690_v28 = vunpack.c.l.bf16 %v1621_v18  ;;  %v1754_v29 = vunpack.c.l.bf16 %v1653_v19  ;;  %v1648_v53 = vld [vmem:[%s2896_s26 + $0x100] sm:$0xff]  ;;  %v1647_v4 = vld [vmem:[%s2896_s26 + $0xf8] sm:$0xff] }
 0x34a   : > { %1887 = vmatprep.subr.mxu1 %v1767_v1  ;;  %1817 = vmatpush1.msra.mxu0 %v1702_v57  ;;  %v1689_v32 = vunpack.c.h.bf16 %v1620_v23  ;;  %v1753_v33 = vunpack.c.h.bf16 %v1652_v0  ;;  %v1688_v34 = vunpack.c.l.bf16 %v1620_v23  ;;  %v1752_v35 = vunpack.c.l.bf16 %v1652_v0  ;;  %v1679_v1 = vld [vmem:[%s2896_s26 + $0x1f8] sm:$0xff] }
 0x34b   : > { %1888 = vmatpush1.msra.mxu1 %v1766_v55  ;;  %1818 = vmatprep.subr.mxu0 %v1701_v5  ;;  %v1687_v38 = vunpack.c.h.bf16 %v1619_v30  ;;  %v1751_v39 = vunpack.c.h.bf16 %v1651_v31  ;;  %v1686_v40 = vunpack.c.l.bf16 %v1619_v30  ;;  %v1750_v43 = vunpack.c.l.bf16 %v1651_v31  ;;  %v1646_v5 = vld [vmem:[%s2896_s26 + $0xf0] sm:$0xff] }
 0x34c   : > { %1889 = vmatprep.subr.mxu1 %v1765_v63  ;;  %1819 = vmatpush1.msra.mxu0 %v1700_v6  ;;  %v1685_v47 = vunpack.c.h.bf16 %v1618_v36  ;;  %v1749_v48 = vunpack.c.h.bf16 %v1650_v37  ;;  %v1684_v50 = vunpack.c.l.bf16 %v1618_v36  ;;  %v1748_v51 = vunpack.c.l.bf16 %v1650_v37  ;;  %v1678_v63 = vld [vmem:[%s2896_s26 + $0x1f0] sm:$0xff] }
 0x34d   : > { %1890 = vmatpush1.msra.mxu1 %v1764_v7  ;;  %1820 = vmatprep.subr.mxu0 %v1699_v59  ;;  %v1683_v54 = vunpack.c.h.bf16 %v1617_v26  ;;  %v1747_v56 = vunpack.c.h.bf16 %v1649_v27  ;;  %v1682_v62 = vunpack.c.l.bf16 %v1617_v26  ;;  %v1746_v60 = vunpack.c.l.bf16 %v1649_v27  ;;  %v1645_v59 = vld [vmem:[%s2896_s26 + $0xe8] sm:$0xff] }
 0x34e   : > { %1891 = vmatprep.subr.mxu1 %v1763_v3  ;;  %1821 = vmatpush1.msra.mxu0 %v1698_v8  ;;  %v1681_v57 = vunpack.c.h.bf16 %v1616_v52  ;;  %v1745_v55 = vunpack.c.h.bf16 %v1648_v53  ;;  %v1680_v42 = vunpack.c.l.bf16 %v1616_v52  ;;  %v1744_v61 = vunpack.c.l.bf16 %v1648_v53  ;;  %v1677_v3 = vld [vmem:[%s2896_s26 + $0x1e8] sm:$0xff] }
 0x34f   : > { %1892 = vmatpush1.msra.mxu1 %v1762_v9  ;;  %1822 = vmatprep.subr.mxu0 %v1697_v12  ;;  %v1743_v6 = vunpack.c.h.bf16 %v1647_v4  ;;  %v1807_v7 = vunpack.c.h.bf16 %v1679_v1  ;;  %v1742_v2 = vunpack.c.l.bf16 %v1647_v4  ;;  %v1806_v45 = vunpack.c.l.bf16 %v1679_v1  ;;  %v1644_v12 = vld [vmem:[%s2896_s26 + $0xe0] sm:$0xff] }
 0x350   : > { %1893 = vmatprep.subr.mxu1 %v1761_v44  ;;  %1823 = vmatpush1.msra.mxu0 %v1696_v13  ;;  %v1741_v8 = vunpack.c.h.bf16 %v1646_v5  ;;  %v1805_v9 = vunpack.c.h.bf16 %v1678_v63  ;;  %v1740_v10 = vunpack.c.l.bf16 %v1646_v5  ;;  %v1804_v11 = vunpack.c.l.bf16 %v1678_v63  ;;  %v1676_v44 = vld [vmem:[%s2896_s26 + $0x1e0] sm:$0xff] }
 0x351   : > { %1894 = vmatpush1.msra.mxu1 %v1760_v41  ;;  %1824 = vmatprep.subr.mxu0 %v1695_v49  ;;  %v1739_v13 = vunpack.c.h.bf16 %v1645_v59  ;;  %v1803_v41 = vunpack.c.h.bf16 %v1677_v3  ;;  %v1738_v14 = vunpack.c.l.bf16 %v1645_v59  ;;  %v1802_v46 = vunpack.c.l.bf16 %v1677_v3  ;;  %v1643_v49 = vld [vmem:[%s2896_s26 + $0xd8] sm:$0xff] }
 0x352   : > { %1895 = vmatprep.subr.mxu1 %v1759_v15  ;;  %1825 = vmatpush1.msra.mxu0 %v1694_v16  ;;  %v1675_v15 = vld [vmem:[%s2896_s26 + $0x1d8] sm:$0xff]  ;;  %v1737_v16 = vunpack.c.h.bf16 %v1644_v12  ;;  %v1736_v18 = vunpack.c.l.bf16 %v1644_v12  ;;  %v1800_v19 = vunpack.c.l.bf16 %v1676_v44  ;;  %v1734_v23 = vunpack.c.l.bf16 %v1643_v49 }
 0x353   : > { %1896 = vmatpush1.msra.mxu1 %v1758_v17  ;;  %1826 = vmatprep.subr.mxu0 %v1693_v20  ;;  %v1801_v17 = vunpack.c.h.bf16 %v1676_v44  ;;  %v1642_v20 = vld [vmem:[%s2896_s26 + $0xd0] sm:$0xff]  ;;  %v1798_v0 = vunpack.c.l.bf16 %v1675_v15 }
 0x354   : > { %1897 = vmatprep.subr.mxu1 %v1757_v21  ;;  %1827 = vmatpush1.msra.mxu0 %v1692_v22  ;;  %v1674_v21 = vld [vmem:[%s2896_s26 + $0x1d0] sm:$0xff]  ;;  %v1735_v22 = vunpack.c.h.bf16 %v1643_v49  ;;  %v1732_v30 = vunpack.c.l.bf16 %v1642_v20 }
 0x355   : > { %1898 = vmatpush1.msra.mxu1 %v1756_v58  ;;  %1828 = vmatprep.subr.mxu0 %v1691_v24  ;;  %v1799_v58 = vunpack.c.h.bf16 %v1675_v15  ;;  %v1641_v24 = vld [vmem:[%s2896_s26 + $0xc8] sm:$0xff]  ;;  %v1796_v31 = vunpack.c.l.bf16 %v1674_v21 }
 0x356   : > { %1899 = vmatprep.subr.mxu1 %v1755_v25  ;;  %1829 = vmatpush1.msra.mxu0 %v1690_v28  ;;  %v1673_v25 = vld [vmem:[%s2896_s26 + $0x1c8] sm:$0xff]  ;;  %v1733_v28 = vunpack.c.h.bf16 %v1642_v20  ;;  %v1730_v36 = vunpack.c.l.bf16 %v1641_v24 }
 0x357   : > { %1900 = vmatpush1.msra.mxu1 %v1754_v29  ;;  %1830 = vmatprep.subr.mxu0 %v1689_v32  ;;  %v1797_v29 = vunpack.c.h.bf16 %v1674_v21  ;;  %v1640_v32 = vld [vmem:[%s2896_s26 + $0xc0] sm:$0xff]  ;;  %v1794_v37 = vunpack.c.l.bf16 %v1673_v25 }
 0x358   : > { %1901 = vmatprep.subr.mxu1 %v1753_v33  ;;  %1831 = vmatpush1.msra.mxu0 %v1688_v34  ;;  %v1672_v33 = vld [vmem:[%s2896_s26 + $0x1c0] sm:$0xff]  ;;  %v1731_v34 = vunpack.c.h.bf16 %v1641_v24  ;;  %v1728_v26 = vunpack.c.l.bf16 %v1640_v32 }
 0x359   : > { %1902 = vmatpush1.msra.mxu1 %v1752_v35  ;;  %1832 = vmatprep.subr.mxu0 %v1687_v38  ;;  %v1795_v35 = vunpack.c.h.bf16 %v1673_v25  ;;  %v1639_v38 = vld [vmem:[%s2896_s26 + $0xb8] sm:$0xff]  ;;  %v1792_v27 = vunpack.c.l.bf16 %v1672_v33 }
 0x35a   : > { %1903 = vmatprep.subr.mxu1 %v1751_v39  ;;  %1833 = vmatpush1.msra.mxu0 %v1686_v40  ;;  %v1671_v39 = vld [vmem:[%s2896_s26 + $0x1b8] sm:$0xff]  ;;  %v1729_v40 = vunpack.c.h.bf16 %v1640_v32  ;;  %v1726_v52 = vunpack.c.l.bf16 %v1639_v38 }
 0x35b   : > { %1904 = vmatpush1.msra.mxu1 %v1750_v43  ;;  %1834 = vmatprep.subr.mxu0 %v1685_v47  ;;  %v1793_v43 = vunpack.c.h.bf16 %v1672_v33  ;;  %v1638_v47 = vld [vmem:[%s2896_s26 + $0xb0] sm:$0xff]  ;;  %v1790_v53 = vunpack.c.l.bf16 %v1671_v39  ;;  %v1615_v25 = vld [vmem:[#allocation2 + $0x8] sm:$0xff] }
 0x35c   : > { %1905 = vmatprep.subr.mxu1 %v1749_v48  ;;  %1835 = vmatpush1.msra.mxu0 %v1684_v50  ;;  %v1670_v48 = vld [vmem:[%s2896_s26 + $0x1b0] sm:$0xff]  ;;  %v1727_v50 = vunpack.c.h.bf16 %v1639_v38  ;;  %v1724_v4 = vunpack.c.l.bf16 %v1638_v47 }
 0x35d   : > { %1906 = vmatpush1.msra.mxu1 %v1748_v51  ;;  %1836 = vmatprep.subr.mxu0 %v1683_v54  ;;  %v1791_v51 = vunpack.c.h.bf16 %v1671_v39  ;;  %v1637_v54 = vld [vmem:[%s2896_s26 + $0xa8] sm:$0xff]  ;;  %v1788_v1 = vunpack.c.l.bf16 %v1670_v48  ;;  %v1950_v33 = vld [vmem:[%s444_s23] sm:$0x3] }
 0x35e   : > { %1907 = vmatprep.subr.mxu1 %v1747_v56  ;;  %1837 = vmatpush1.msra.mxu0 %v1682_v62  ;;  %v1669_v56 = vld [vmem:[%s2896_s26 + $0x1a8] sm:$0xff]  ;;  %v1725_v62 = vunpack.c.h.bf16 %v1638_v47  ;;  %v1722_v5 = vunpack.c.l.bf16 %v1637_v54 }
 0x35f   : > { %1908 = vmatpush1.msra.mxu1 %v1746_v60  ;;  %1838 = vmatprep.subr.mxu0 %v1681_v57  ;;  %v1789_v60 = vunpack.c.h.bf16 %v1670_v48  ;;  %v1636_v57 = vld [vmem:[%s2896_s26 + $0xa0] sm:$0xff]  ;;  %v1786_v63 = vunpack.c.l.bf16 %v1669_v56 }
 0x360   : > { %1909 = vmatprep.subr.mxu1 %v1745_v55  ;;  %1839 = vmatpush1.msra.mxu0 %v1680_v42  ;;  %v1668_v55 = vld [vmem:[%s2896_s26 + $0x1a0] sm:$0xff]  ;;  %v1723_v42 = vunpack.c.h.bf16 %v1637_v54  ;;  %v1720_v59 = vunpack.c.l.bf16 %v1636_v57 }
 0x361   : > { %1910 = vmatpush1.msra.mxu1 %v1744_v61  ;;  %1840 = vmatprep.subr.mxu0 %v1743_v6  ;;  %v1787_v61 = vunpack.c.h.bf16 %v1669_v56  ;;  %v1635_v6 = vld [vmem:[%s2896_s26 + $0x98] sm:$0xff]  ;;  %v1784_v3 = vunpack.c.l.bf16 %v1668_v55 }
 0x362   : > { %1911 = vmatprep.subr.mxu1 %v1807_v7  ;;  %1841 = vmatpush2.msra.mxu0 %v1742_v2  ;;  %v1667_v7 = vld [vmem:[%s2896_s26 + $0x198] sm:$0xff]  ;;  %v1721_v2 = vunpack.c.h.bf16 %v1636_v57  ;;  %v1718_v12 = vunpack.c.l.bf16 %v1635_v6 }
 0x363   : > { %1912 = vmatpush2.msra.mxu1 %v1806_v45  ;;  %1842 = vmatprep.subr.mxu0 %v1741_v8  ;;  %v1785_v45 = vunpack.c.h.bf16 %v1668_v55  ;;  %v1634_v8 = vld [vmem:[%s2896_s26 + $0x90] sm:$0xff]  ;;  %v1782_v44 = vunpack.c.l.bf16 %v1667_v7 }
 0x364   : > { %1913 = vmatprep.subr.mxu1 %v1805_v9  ;;  %1843 = vmatpush2.msra.mxu0 %v1740_v10  ;;  %v1666_v9 = vld [vmem:[%s2896_s26 + $0x190] sm:$0xff]  ;;  %v1719_v10 = vunpack.c.h.bf16 %v1635_v6  ;;  %v1716_v49 = vunpack.c.l.bf16 %v1634_v8 }
 0x365   : > { %1914 = vmatpush2.msra.mxu1 %v1804_v11  ;;  %1844 = vmatprep.subr.mxu0 %v1739_v13  ;;  %v1783_v11 = vunpack.c.h.bf16 %v1667_v7  ;;  %v1633_v13 = vld [vmem:[%s2896_s26 + $0x88] sm:$0xff]  ;;  %v1780_v15 = vunpack.c.l.bf16 %v1666_v9 }
 0x366   : > { %1915 = vmatprep.subr.mxu1 %v1803_v41  ;;  %1845 = vmatpush2.msra.mxu0 %v1738_v14  ;;  %v1665_v41 = vld [vmem:[%s2896_s26 + $0x188] sm:$0xff]  ;;  %v1717_v14 = vunpack.c.h.bf16 %v1634_v8  ;;  %v1714_v20 = vunpack.c.l.bf16 %v1633_v13 }
 0x367   : > { %1916 = vmatpush2.msra.mxu1 %v1802_v46  ;;  %1846 = vmatprep.subr.mxu0 %v1737_v16  ;;  %v1781_v46 = vunpack.c.h.bf16 %v1666_v9  ;;  %v1632_v16 = vld [vmem:[%s2896_s26 + $0x80] sm:$0xff]  ;;  %v1778_v21 = vunpack.c.l.bf16 %v1665_v41 }
 0x368   : > { %1917 = vmatprep.subr.mxu1 %v1801_v17  ;;  %1847 = vmatpush2.msra.mxu0 %v1736_v18  ;;  %v1664_v17 = vld [vmem:[%s2896_s26 + $0x180] sm:$0xff]  ;;  %v1715_v18 = vunpack.c.h.bf16 %v1633_v13  ;;  %s2648_s26 = smov [#allocation15]  }
 0x369   : > { %1918 = vmatpush2.msra.mxu1 %v1800_v19  ;;  %1848 = vmatprep.subr.mxu0 %v1735_v22  ;;  %v1779_v19 = vunpack.c.h.bf16 %v1665_v41  ;;  %v1713_v22 = vunpack.c.h.bf16 %v1632_v16  ;;  %v1776_v24 = vunpack.c.l.bf16 %v1664_v17  ;;  %s2561_s19 = sshll.u32 %s2648_s26, 4  ;;  %s2562_s19 = int_to_ptr.vmem [resolvable:$false] %s2561_s19 }
 0x36a   : > { %1919 = vmatprep.subr.mxu1 %v1799_v58  ;;  %1849 = vmatpush2.msra.mxu0 %v1734_v23  ;;  %v1777_v58 = vunpack.c.h.bf16 %v1664_v17  ;;  %v1712_v23 = vunpack.c.l.bf16 %v1632_v16  ;;  %s2563_s10 = scalar_lea.vmem %s2562_s19, 512  ;;  %p2564_p6 = scmp.lt.s32.totalorder %s2024_s14, %s2562_s19 }
 0x36b   : > { %1920 = vmatpush2.msra.mxu1 %v1798_v0  ;;  %1850 = vmatprep.subr.mxu0 %v1733_v28  ;;  %v1613_v0 = vld [vmem:[#allocation2] sm:$0xff]  ;;  %v1612_v28 = vld [vmem:[#allocation2 + $0x10] sm:$0xff]  ;;  %p2565_p3 = scmp.lt.s32.totalorder %s2563_s10, %s2557_s25 }
 0x36c   : > { %1921 = vmatprep.subr.mxu1 %v1797_v29  ;;  %1851 = vmatpush2.msra.mxu0 %v1732_v30  ;;  %v1614_v29 = vld [vmem:[#allocation2 + $0x18] sm:$0xff]  ;;  %v1952_v30 = vlaneseq }
 0x36d   : > { %1922 = vmatpush2.msra.mxu1 %v1796_v31  ;;  %1852 = vmatprep.subr.mxu0 %v1731_v34  ;;  %p2566_p4 = por %p2565_p3, %p2564_p6 }
 0x36e   : > { %1923 = vmatprep.subr.mxu1 %v1795_v35  ;;  %1853 = vmatpush2.msra.mxu0 %v1730_v36  ;;  %v1953_v31 = vshrl.u32 %v1952_v30, 7  ;;  %v1964_v35 = vld [vmem:[%s2911_s24] sm:$0x3] }
 0x36f   : > { %1924 = vmatpush2.msra.mxu1 %v1794_v37  ;;  %1854 = vmatprep.subr.mxu0 %v1729_v40  ;;  %p2567_p9 = pnand %p2566_p4, %p2560_p13 }
 0x370   : > { %1925 = vmatprep.subr.mxu1 %v1793_v43  ;;  %1855 = vmatpush2.msra.mxu0 %v1728_v26  ;;  %v1954_v32 = vsub.s32 0, %v1953_v31  ;;  %v1958_v34 = vsub.s32 1, %v1953_v31 }
 0x371   : > { %1926 = vmatpush2.msra.mxu1 %v1792_v27  ;;  %1856 = vmatprep.subr.mxu0 %v1727_v50 }
 0x372   : > { %1927 = vmatprep.subr.mxu1 %v1791_v51  ;;  %1857 = vmatpush2.msra.mxu0 %v1726_v52  ;;  %v1955_v36 = vrot.slane %v1950_v33, %v1954_v32  ;;  %v1969_v40 = vrot.slane %v1964_v35, %v1954_v32  ;;  %v1959_v43 = vrot.slane %v1950_v33, %v1958_v34 }
 0x373   : > { %1928 = vmatpush2.msra.mxu1 %v1790_v53  ;;  %1858 = vmatprep.subr.mxu0 %v1725_v62  ;;  %v1973_v50 = vrot.slane %v1964_v35, %v1958_v34 }
 0x374   : > { %1929 = vmatprep.subr.mxu1 %v1789_v60  ;;  %1859 = vmatpush2.msra.mxu0 %v1724_v4 }
 0x375   : > { %1930 = vmatpush2.msra.mxu1 %v1788_v1  ;;  %1860 = vmatprep.subr.mxu0 %v1723_v42 }
 0x376   : > { %1931 = vmatprep.subr.mxu1 %v1787_v61  ;;  %1861 = vmatpush2.msra.mxu0 %v1722_v5 }
 0x377   : > { %1932 = vmatpush2.msra.mxu1 %v1786_v63  ;;  %1862 = vmatprep.subr.mxu0 %v1721_v2 }
 0x378   : > { %1933 = vmatprep.subr.mxu1 %v1785_v45  ;;  %1863 = vmatpush2.msra.mxu0 %v1720_v59 }
 0x379   : > { %1934 = vmatpush2.msra.mxu1 %v1784_v3  ;;  %1864 = vmatprep.subr.mxu0 %v1719_v10 }
 0x37a   : > { %1935 = vmatprep.subr.mxu1 %v1783_v11  ;;  %1865 = vmatpush2.msra.mxu0 %v1718_v12 }
 0x37b   : > { %1936 = vmatpush2.msra.mxu1 %v1782_v44  ;;  %1866 = vmatprep.subr.mxu0 %v1717_v14 }
 0x37c   : > { %1937 = vmatprep.subr.mxu1 %v1781_v46  ;;  %1867 = vmatpush2.msra.mxu0 %v1716_v49 }
 0x37d   : > { %1938 = vmatpush2.msra.mxu1 %v1780_v15  ;;  %1868 = vmatprep.subr.mxu0 %v1715_v18 }
 0x37e   : > { %1939 = vmatprep.subr.mxu1 %v1779_v19  ;;  %1869 = vmatpush2.msra.mxu0 %v1714_v20 }
 0x37f   : > { %1940 = vmatpush2.msra.mxu1 %v1778_v21  ;;  %1870 = vmatprep.subr.mxu0 %v1713_v22 }
 0x380   : > { %1941 = vmatprep.subr.mxu1 %v1777_v58  ;;  %1871 = vmatpush2.msra.mxu0 %v1712_v23 }
 0x381   : > { %1872 = vmatprep.mubr.f32.mxu0 %v1613_v0  ;;  %1942 = vmatpush2.msra.mxu1 %v1776_v24 }
 0x382   : > { %1943 = vmatprep.mubr.f32.mxu1 %v1615_v25  ;;  %1873 = vmatmul.mubr.f32.vlgmr.msra.gmra.mxu0 %v1612_v28 }
 0x383   : > { %1944 = vmatmul.mubr.f32.vlgmr.msra.gmra.mxu1 %v1614_v29 }
 0x442   : > { %v1874_v37 = vpop.f32.mrf.mxu0 }
 0x443   : > { %v1945_v38 = vpop.f32.mrf.mxu1 }
 0x444   : > { %v1946_v39 = vadd.f32 %v1945_v38, %v1874_v37  ;;  %v1876_v26 = vpop.f32.mrf.mxu0 }
 0x445   : > { %v1947_v27 = vpop.f32.mrf.mxu1 }
 0x446   : > { %v1962_v47 = vmul.f32 %v1955_v36, %v1946_v39  ;;  %v1948_v48 = vadd.f32 %v1947_v27, %v1876_v26 }
 0x448   : > { %v1976_v51 = vadd.f32 %v1969_v40, %v1962_v47  ;;  %v1963_v52 = vmul.f32 %v1959_v43, %v1948_v48 }
 0x44a   : > { %v1980_v53 = vmin.f32 %v1976_v51, 20.0  ;;  %v1977_v54 = vadd.f32 %v1973_v50, %v1963_v52  ;;  %vm1978_vm2 = vcmp.gt.f32.partialorder %v1976_v51, 20.0 }
 0x44c   : > { %v1982_v56 = vmul.f32 1.442695, %v1980_v53  ;;  %v1981_v62 = vmin.f32 %v1977_v54, 20.0  ;;  %vm1979_vm4 = vcmp.gt.f32.partialorder %v1977_v54, 20.0 }
 0x44e   : > { %2363 = vpow2.f32 %v1982_v56  ;;  %v1984_v60 = vmul.f32 1.442695, %v1981_v62 }
 0x450   : > { %2365 = vpow2.f32 %v1984_v60 }
 0x45b   : > { %v2364_v4 = vpop.eup %2363 }
 0x45c   : > { %v1986_v1 = vadd.f32 1.0, %v2364_v4  ;;  %v1989_v42 = vmul.f32 -0.5, %v2364_v4  ;;  %v1992_v63 = vand.u32 2147483647, %v2364_v4 }
 0x45d   : > { %v2366_v57 = vpop.eup %2365 }
 0x45e   : > { %2367 = vlog2.f32 %v1986_v1  ;;  %v1995_v55 = vadd.f32 1.0, %v2366_v57  ;;  %v1998_v61 = vmul.f32 -0.5, %v2366_v57  ;;  %v1990_v5 = vadd.f32 1.0, %v1989_v42 }
 0x45f   : > { %v2001_v2 = vand.u32 2147483647, %v2366_v57  ;;  %vm1993_vm1 = vcmp.lt.f32.partialorder %v1992_v63, 0.0004427343 }
 0x460   : > { %2369 = vlog2.f32 %v1995_v55  ;;  %v1999_v6 = vadd.f32 1.0, %v1998_v61  ;;  %v1991_v59 = vmul.f32 %v2364_v4, %v1990_v5 }
 0x461   : > { %vm2002_vm3 = vcmp.lt.f32.partialorder %v2001_v2, 0.0004427343 }
 0x462   : > { %v2000_v10 = vmul.f32 %v2366_v57, %v1999_v6 }
 0x46b   : > { %v2368_v7 = vpop.eup %2367 }
 0x46c   : > { %v1988_v45 = vmul.f32 0.6931472, %v2368_v7 }
 0x46d   : > { %v2370_v3 = vpop.eup %2369 }
 0x46e   : > { %v1994_v8 = vsel %vm1993_vm1, %v1991_v59, %v1988_v45  ;;  %v1997_v9 = vmul.f32 0.6931472, %v2370_v3 }
 0x46f   : > { %v2004_v11 = vsel %vm1978_vm2, %v1976_v51, %v1994_v8 }
 0x470   : > { %v2003_v12 = vsel %vm2002_vm3, %v2000_v10, %v1997_v9  ;;  %2006 = vst [vmem:[%s2913_s17] sm:$0xff] %v2004_v11 }
 0x471   : > { %v2005_v44 = vsel %vm1979_vm4, %v1977_v54, %v2003_v12 }
 0x472   : > { %2007 = vst [vmem:[%s2913_s17 + $0x8] sm:$0xff] %v2005_v44 }
 0x473   : > { %2570 = shalt.err (!%p2567_p9)
}
 0x474   : > { %s2571_s5 = scalar_lea.hbm %s3078_s15, 256  ;;  %s2575_s21 = scalar_lea.hbm %s3123_s8, 1024 }
 0x475   : > { %p2572_p2 = scmp.ne.s32.totalorder %s3078_s15, %s2571_s5  ;;  %p2576_p11 = scmp.lt.s32.totalorder %s3078_s15, %s3123_s8 }
 0x476   : > { %p2577_p0 = scmp.lt.s32.totalorder %s2575_s21, %s2571_s5 }
 0x477   : > { %p2573_p7 = pnand %p2572_p2, %p3171_p12 }
 0x478   : > { %p2578_p10 = por %p2577_p0, %p2576_p11 }
 0x479   : > { %p2574_p8 = pneg %p2573_p7 }
 0x47b   : > { %p2579_p5 = pnand %p2578_p10, %p2574_p8 }
 0x47d   : > { %2582 = shalt.err (!%p2579_p5)
}
 0x47e   : > { %2231 = dma.vmem_to_hbm [thread:$0]  (%p3171_p12), %s2024_s14, 256, %s3078_s15, %s2009_s9  }
 0x47f PF: > { %p2271_p1 = scmp.ge.s32.totalorder %s2633_s30, 2  ;;  %s2035_s17 = sand.u32 1, %s2621_s27  }
 0x480   : > { %p3172_p13 = scmp.ne.s32.totalorder %s3142_s12, 0  ;;  %s2036_s11 = scalar_lea.sflag [#allocation5], %s2035_s17 }
 0x482   : > { %p2257_p6 = pnand %p2271_p1, %p3172_p13 }
 0x484   : > { %p2258_p3 = pneg %p2257_p6 }
 0x486   : > { %2616 = dma.done.wait (%p2258_p3), %s2036_s11, 256  }
 0x487   : > { %2618 = vsyncadd (%p2258_p3), %s2036_s11, 4294967040  ;;  %s3173_s30 = sld [smem:[#allocation21_spill]]  ;;  %s3175_s27 = smov %s2625_s28 }
 0x488   : > { %s3174_s18 = sld [smem:[#allocation22_spill]]  ;;  %s3176_s28 = smov %s2629_s29 }
 0x48d   : > { %p24_p4 = scmp.ge.s32.totalorder %s3173_s30, 6  }
 0x48e   : > { %s3177_s29 = smov %s3174_s18 }
 0x48f   :  { %26 = sbr.rel (!%p24_p4) target bundleno = 12 (0xc), region = 136 }
 0x494   :  { %2041 = vsyncpa [#allocation4], 1 }
 0x495   :  { %2043 = vsyncpa [#allocation4 + $0x1], 1 }
 0x496   :  { %2044 = vsyncpa [#allocation7], 1 }
 0x497   :  { %2045 = vsyncpa [#allocation10], 1 }
 0x498   :  { %2046 = vsyncpa [#allocation13], 1 }
 0x499   :  { %2048 = vsyncpa [#allocation13 + $0x1], 1 }
 0x49a   :  { %2049 = vsyncpa [#allocation5], 1 }
 0x49b   :  { %2051 = vsyncpa [#allocation5 + $0x1], 1 }

</bundles_post_ra>
